<compile_context>
chip_gen: v6e
topology: v6e:2x2x1
jax: 0.10.0
libtpu: 0.0.40
codegen_flags: <defaults>
</compile_context>

<pallas_src>
import math
import numpy as np
import jax
import jax.numpy as jnp
from jax.experimental import pallas as pl
from jax.experimental.pallas import tpu as pltpu


H_MAX = 0.05  # tutorial ode_solve step bound


def _elu(x):
    # PyTorch nn.ELU(alpha=1): x if x > 0 else exp(x) - 1
    # (exp-1 form instead of expm1 to stay on guaranteed Mosaic lowerings;
    #  min() guard keeps the inactive branch finite.)
    return jnp.where(x > 0, x, jnp.exp(jnp.minimum(x, 0.0)) - 1.0)


def euler_step_sizes(t):
    """Host-side glue: flatten ode_solve's per-interval Euler steps into a
    Python list of float step sizes (baked into the kernel as constants)."""
    t_np = np.asarray(t, dtype=np.float64)
    hs = []
    for i in range(len(t_np) - 1):
        t0, t1 = float(t_np[i]), float(t_np[i + 1])
        n_steps = int(math.ceil(abs(t1 - t0) / H_MAX))
        if n_steps == 0:
            continue
        h = float(np.float32((t1 - t0) / n_steps))
        hs.extend([h] * n_steps)
    return hs


def _align8(x):
    return (x + 7) & ~7


def pack_decoder_params(params):
    """One-time (per model) parameter preparation, off the per-call hot path.

    * Fuses the bias-free-in-between l2h -> h2o composition:
        Wd = Wl2h @ Wh2o,  bd = bl2h @ Wh2o + bh2o   (exact algebra, fp reassoc only)
    * Packs w1,b1,w2,b2,w3,b3,wd,bd into a single lane-padded (rows,128) f32
      slab with 8-aligned row offsets, so the kernel needs ONE input DMA.
    Returns (slab, dims, offsets).
    """
    w1 = np.asarray(params["w1"], np.float32)
    b1 = np.asarray(params["b1"], np.float32)
    w2 = np.asarray(params["w2"], np.float32)
    b2 = np.asarray(params["b2"], np.float32)
    w3 = np.asarray(params["w3"], np.float32)
    b3 = np.asarray(params["b3"], np.float32)
    wl2h = np.asarray(params["wl2h"], np.float32)
    bl2h = np.asarray(params["bl2h"], np.float32)
    wh2o = np.asarray(params["wh2o"], np.float32)
    bh2o = np.asarray(params["bh2o"], np.float32)

    L, H = w1.shape
    O = wh2o.shape[1]

    wd = (wl2h @ wh2o).astype(np.float32)               # (L, O)
    bd = (bl2h @ wh2o + bh2o).astype(np.float32)        # (1, O)

    entries = [("w1", w1), ("b1", b1), ("w2", w2), ("b2", b2),
               ("w3", w3), ("b3", b3), ("wd", wd), ("bd", bd)]

    offs = {}
    r = 0
    for name, arr in entries:
        offs[name] = r
        r = _align8(r + arr.shape[0])
    total_rows = r                                      # 8-aligned

    slab = np.zeros((total_rows, 128), np.float32)      # lane-padded width
    for name, arr in entries:
        rr, cc = arr.shape
        slab[offs[name]:offs[name] + rr, :cc] = arr

    return jnp.asarray(slab), (L, H, O), offs


def make_decoder_kernel(h_steps, dims, offs):
    """h_steps: Python list of float Euler step sizes (trace-time constants)."""
    L, H, O = dims

    # Distinct step sizes (usually exactly 1 for a uniform time grid).
    uniq_h = []
    for h in h_steps:
        if h not in uniq_h:
            uniq_h.append(h)

    def kernel(z0_ref, slab_ref, out_ref):
        B = z0_ref.shape[0]

        # --- Prologue: slice the packed slab once (static offsets), hoist
        #     everything loop-invariant so operands stay vreg-resident. ---
        w1 = slab_ref[offs["w1"]:offs["w1"] + L, 0:H]
        w2 = slab_ref[offs["w2"]:offs["w2"] + H, 0:H]
        w3 = slab_ref[offs["w3"]:offs["w3"] + H, 0:L]
        wd = slab_ref[offs["wd"]:offs["wd"] + L, 0:O]

        # Pre-broadcast biases to full activation shape (hoisted: JAX does
        # not CSE broadcast_in_dim across the 21x unroll).
        b1 = jnp.broadcast_to(slab_ref[offs["b1"]:offs["b1"] + 1, 0:H], (B, H))
        b2 = jnp.broadcast_to(slab_ref[offs["b2"]:offs["b2"] + 1, 0:H], (B, H))
        b3 = slab_ref[offs["b3"]:offs["b3"] + 1, 0:L]
        bd = jnp.broadcast_to(slab_ref[offs["bd"]:offs["bd"] + 1, 0:O], (B, O))

        # Fold the Euler step size into w3/b3 once per distinct h (hoisted),
        # so each step's update is just z = z + (a2 @ w3h + b3h): no per-step
        # scalar splat + VPU multiply on the serial critical path.
        scaled = {
            h: (jnp.float32(h) * w3,
                jnp.broadcast_to(jnp.float32(h) * b3, (B, L)))
            for h in uniq_h
        }

        z = z0_ref[...].astype(jnp.float32)

        # --- Fully unrolled Euler integration (trace-time constant steps). ---
        for h in h_steps:
            w3h, b3h = scaled[h]
            a1 = _elu(jnp.dot(z, w1, preferred_element_type=jnp.float32) + b1)
            a2 = _elu(jnp.dot(a1, w2, preferred_element_type=jnp.float32) + b2)
            z = z + jnp.dot(a2, w3h, preferred_element_type=jnp.float32) + b3h

        # --- Fused decoder tail: single matmul replaces l2h -> h2o. ---
        out = jnp.dot(z, wd, preferred_element_type=jnp.float32) + bd
        out_ref[...] = out.astype(out_ref.dtype)

    return kernel


def neural_ode_decoder_pallas(z0, t, packed):
    slab, dims, offs = packed
    _, _, output_dim = dims
    bs = z0.shape[0]

    h_steps = euler_step_sizes(t)
    kernel = make_decoder_kernel(h_steps, dims, offs)

    vmem_spec = pl.BlockSpec(memory_space=pltpu.MemorySpace.VMEM)

    # Gridless, whole-array VMEM residents: total working set is <100 KiB,
    # so no BlockSpec tiling / pipelining machinery is warranted.
    # (On v7x with a large batch: add grid=(B//tb,) over batch with
    #  dimension_semantics=("parallel",) to use both TensorCores.)
    return pl.pallas_call(
        kernel,
        out_shape=jax.ShapeDtypeStruct((bs, output_dim), jnp.float32),
        in_specs=[vmem_spec, vmem_spec],
        out_specs=vmem_spec,
    )(z0, slab)


def neural_ode_decoder_ref(z0, t, params):
    """Pure-JAX reference of the original (unfused) semantics, for verification."""
    h_steps = euler_step_sizes(t)
    z = z0.astype(jnp.float32)
    for h in h_steps:
        a1 = _elu(z @ params["w1"] + params["b1"])
        a2 = _elu(a1 @ params["w2"] + params["b2"])
        dz = a2 @ params["w3"] + params["b3"]
        z = z + jnp.float32(h) * dz
    hs = z @ params["wl2h"] + params["bl2h"]
    return hs @ params["wh2o"] + params["bh2o"]


def init_params(key, latent_dim, hidden_dim, output_dim):
    """Deterministic init mimicking PyTorch Linear default (uniform +/- 1/sqrt(fan_in)).
    Weights stored pre-transposed as (in, out); biases as (1, out)."""
    def linear(k, fan_in, fan_out):
        kw, kb = jax.random.split(k)
        bound = 1.0 / math.sqrt(fan_in)
        w = jax.random.uniform(kw, (fan_in, fan_out), jnp.float32, -bound, bound)
        b = jax.random.uniform(kb, (1, fan_out), jnp.float32, -bound, bound)
        return w, b

    ks = jax.random.split(key, 5)
    w1, b1 = linear(ks[0], latent_dim, hidden_dim)       # NNODEF.lin1
    w2, b2 = linear(ks[1], hidden_dim, hidden_dim)       # NNODEF.lin2
    w3, b3 = linear(ks[2], hidden_dim, latent_dim)       # NNODEF.lin3
    wl2h, bl2h = linear(ks[3], latent_dim, hidden_dim)   # l2h
    wh2o, bh2o = linear(ks[4], hidden_dim, output_dim)   # h2o
    return dict(w1=w1, b1=b1, w2=w2, b2=b2, w3=w3, b3=b3,
                wl2h=wl2h, bl2h=bl2h, wh2o=wh2o, bh2o=bh2o)


if __name__ == "__main__":
    batch = 8
    latent_dim = 8
    hidden_dim = 32
    output_dim = 16
    time_len = 8

    key = jax.random.PRNGKey(0)
    k_z, k_p = jax.random.split(key)

    z0 = jax.random.normal(k_z, (batch, latent_dim), jnp.float32)
    t = jnp.linspace(0.0, 1.0, time_len, dtype=jnp.float32)   # (time_len,)
    params = init_params(k_p, latent_dim, hidden_dim, output_dim)

    # One-time parameter packing / tail fusion (off the per-call hot path).
    packed = pack_decoder_params(params)

    out = neural_ode_decoder_pallas(z0, t, packed)
    out = jax.block_until_ready(out)

    ref = neural_ode_decoder_ref(z0, t, params)
    assert out.shape == (batch, output_dim)
    np.testing.assert_allclose(np.asarray(out), np.asarray(ref), rtol=1e-4, atol=1e-4)

    print("KERNEL_OK")
</pallas_src>

<mosaic_0001>
module attributes {stable_mosaic.version = 11 : i64} {
  func.func @kernel(%arg0: memref<8x8xf32, #tpu.memory_space<vmem>>, %arg1: memref<112x128xf32, #tpu.memory_space<vmem>>, %arg2: memref<8x16xf32, #tpu.memory_space<vmem>>) attributes {dimension_semantics = [], scalar_prefetch = 0 : i64, scratch_operands = 0 : i64, tpu.core_type = #tpu.core_type<tc>} {
    %c0 = arith.constant 0 : index
    %c0_0 = arith.constant 0 : index
    %0 = vector.load %arg1[%c0, %c0_0] : memref<112x128xf32, #tpu.memory_space<vmem>>, vector<8x32xf32>
    %c16 = arith.constant 16 : index
    %c0_1 = arith.constant 0 : index
    %1 = vector.load %arg1[%c16, %c0_1] : memref<112x128xf32, #tpu.memory_space<vmem>>, vector<32x32xf32>
    %c56 = arith.constant 56 : index
    %c0_2 = arith.constant 0 : index
    %2 = vector.load %arg1[%c56, %c0_2] : memref<112x128xf32, #tpu.memory_space<vmem>>, vector<32x8xf32>
    %c96 = arith.constant 96 : index
    %c0_3 = arith.constant 0 : index
    %3 = vector.load %arg1[%c96, %c0_3] : memref<112x128xf32, #tpu.memory_space<vmem>>, vector<8x16xf32>
    %c8 = arith.constant 8 : index
    %c0_4 = arith.constant 0 : index
    %4 = vector.load %arg1[%c8, %c0_4] : memref<112x128xf32, #tpu.memory_space<vmem>>, vector<1x32xf32>
    %5 = vector.shape_cast %4 : vector<1x32xf32> to vector<1x32xf32>
    %6 = vector.broadcast %5 : vector<1x32xf32> to vector<8x32xf32>
    %c48 = arith.constant 48 : index
    %c0_5 = arith.constant 0 : index
    %7 = vector.load %arg1[%c48, %c0_5] : memref<112x128xf32, #tpu.memory_space<vmem>>, vector<1x32xf32>
    %8 = vector.shape_cast %7 : vector<1x32xf32> to vector<1x32xf32>
    %9 = vector.broadcast %8 : vector<1x32xf32> to vector<8x32xf32>
    %c88 = arith.constant 88 : index
    %c0_6 = arith.constant 0 : index
    %10 = vector.load %arg1[%c88, %c0_6] : memref<112x128xf32, #tpu.memory_space<vmem>>, vector<1x8xf32>
    %c104 = arith.constant 104 : index
    %c0_7 = arith.constant 0 : index
    %11 = vector.load %arg1[%c104, %c0_7] : memref<112x128xf32, #tpu.memory_space<vmem>>, vector<1x16xf32>
    %12 = vector.shape_cast %11 : vector<1x16xf32> to vector<1x16xf32>
    %13 = vector.broadcast %12 : vector<1x16xf32> to vector<8x16xf32>
    %cst = arith.constant 0.0476190485 : f32
    %14 = vector.broadcast %cst : f32 to vector<32x8xf32>
    %15 = arith.mulf %14, %2 : vector<32x8xf32>
    %cst_8 = arith.constant 0.0476190485 : f32
    %16 = vector.broadcast %cst_8 : f32 to vector<1x8xf32>
    %17 = arith.mulf %16, %10 : vector<1x8xf32>
    %18 = vector.shape_cast %17 : vector<1x8xf32> to vector<1x8xf32>
    %19 = vector.broadcast %18 : vector<1x8xf32> to vector<8x8xf32>
    %cst_9 = arith.constant 0.047619056 : f32
    %20 = vector.broadcast %cst_9 : f32 to vector<32x8xf32>
    %21 = arith.mulf %20, %2 : vector<32x8xf32>
    %cst_10 = arith.constant 0.047619056 : f32
    %22 = vector.broadcast %cst_10 : f32 to vector<1x8xf32>
    %23 = arith.mulf %22, %10 : vector<1x8xf32>
    %24 = vector.shape_cast %23 : vector<1x8xf32> to vector<1x8xf32>
    %25 = vector.broadcast %24 : vector<1x8xf32> to vector<8x8xf32>
    %cst_11 = arith.constant 0.0476190448 : f32
    %26 = vector.broadcast %cst_11 : f32 to vector<32x8xf32>
    %27 = arith.mulf %26, %2 : vector<32x8xf32>
    %cst_12 = arith.constant 0.0476190448 : f32
    %28 = vector.broadcast %cst_12 : f32 to vector<1x8xf32>
    %29 = arith.mulf %28, %10 : vector<1x8xf32>
    %30 = vector.shape_cast %29 : vector<1x8xf32> to vector<1x8xf32>
    %31 = vector.broadcast %30 : vector<1x8xf32> to vector<8x8xf32>
    %cst_13 = arith.constant 0.0476190634 : f32
    %32 = vector.broadcast %cst_13 : f32 to vector<32x8xf32>
    %33 = arith.mulf %32, %2 : vector<32x8xf32>
    %cst_14 = arith.constant 0.0476190634 : f32
    %34 = vector.broadcast %cst_14 : f32 to vector<1x8xf32>
    %35 = arith.mulf %34, %10 : vector<1x8xf32>
    %36 = vector.shape_cast %35 : vector<1x8xf32> to vector<1x8xf32>
    %37 = vector.broadcast %36 : vector<1x8xf32> to vector<8x8xf32>
    %cst_15 = arith.constant 0.0476190262 : f32
    %38 = vector.broadcast %cst_15 : f32 to vector<32x8xf32>
    %39 = arith.mulf %38, %2 : vector<32x8xf32>
    %cst_16 = arith.constant 0.0476190262 : f32
    %40 = vector.broadcast %cst_16 : f32 to vector<1x8xf32>
    %41 = arith.mulf %40, %10 : vector<1x8xf32>
    %42 = vector.shape_cast %41 : vector<1x8xf32> to vector<1x8xf32>
    %43 = vector.broadcast %42 : vector<1x8xf32> to vector<8x8xf32>
    %c0_17 = arith.constant 0 : index
    %c0_18 = arith.constant 0 : index
    %44 = vector.load %arg0[%c0_17, %c0_18] : memref<8x8xf32, #tpu.memory_space<vmem>>, vector<8x8xf32>
    %cst_19 = arith.constant dense<0.000000e+00> : vector<8x32xf32>
    %45 = tpu.matmul %44, %0, %cst_19 {dimension_numbers = #tpu.dot_dimension_numbers<[1], [0], [0], [1], [0, 0, 1, 1], [], []>} : vector<8x8xf32>, vector<8x32xf32>, vector<8x32xf32> -> vector<8x32xf32>
    %46 = arith.addf %45, %6 : vector<8x32xf32>
    %cst_20 = arith.constant 0.000000e+00 : f32
    %47 = vector.broadcast %cst_20 : f32 to vector<8x32xf32>
    %48 = arith.cmpf ogt, %46, %47 : vector<8x32xf32>
    %cst_21 = arith.constant 0.000000e+00 : f32
    %49 = vector.broadcast %cst_21 : f32 to vector<8x32xf32>
    %50 = arith.minimumf %46, %49 : vector<8x32xf32>
    %51 = math.exp %50 : vector<8x32xf32>
    %cst_22 = arith.constant 1.000000e+00 : f32
    %52 = vector.broadcast %cst_22 : f32 to vector<8x32xf32>
    %53 = arith.subf %51, %52 : vector<8x32xf32>
    %54 = arith.select %48, %46, %53 : vector<8x32xi1>, vector<8x32xf32>
    %cst_23 = arith.constant dense<0.000000e+00> : vector<8x32xf32>
    %55 = tpu.matmul %54, %1, %cst_23 {dimension_numbers = #tpu.dot_dimension_numbers<[1], [0], [0], [1], [0, 0, 1, 1], [], []>} : vector<8x32xf32>, vector<32x32xf32>, vector<8x32xf32> -> vector<8x32xf32>
    %56 = arith.addf %55, %9 : vector<8x32xf32>
    %cst_24 = arith.constant 0.000000e+00 : f32
    %57 = vector.broadcast %cst_24 : f32 to vector<8x32xf32>
    %58 = arith.cmpf ogt, %56, %57 : vector<8x32xf32>
    %cst_25 = arith.constant 0.000000e+00 : f32
    %59 = vector.broadcast %cst_25 : f32 to vector<8x32xf32>
    %60 = arith.minimumf %56, %59 : vector<8x32xf32>
    %61 = math.exp %60 : vector<8x32xf32>
    %cst_26 = arith.constant 1.000000e+00 : f32
    %62 = vector.broadcast %cst_26 : f32 to vector<8x32xf32>
    %63 = arith.subf %61, %62 : vector<8x32xf32>
    %64 = arith.select %58, %56, %63 : vector<8x32xi1>, vector<8x32xf32>
    %cst_27 = arith.constant dense<0.000000e+00> : vector<8x8xf32>
    %65 = tpu.matmul %64, %15, %cst_27 {dimension_numbers = #tpu.dot_dimension_numbers<[1], [0], [0], [1], [0, 0, 1, 1], [], []>} : vector<8x32xf32>, vector<32x8xf32>, vector<8x8xf32> -> vector<8x8xf32>
    %66 = arith.addf %44, %65 : vector<8x8xf32>
    %67 = arith.addf %66, %19 : vector<8x8xf32>
    %cst_28 = arith.constant dense<0.000000e+00> : vector<8x32xf32>
    %68 = tpu.matmul %67, %0, %cst_28 {dimension_numbers = #tpu.dot_dimension_numbers<[1], [0], [0], [1], [0, 0, 1, 1], [], []>} : vector<8x8xf32>, vector<8x32xf32>, vector<8x32xf32> -> vector<8x32xf32>
    %69 = arith.addf %68, %6 : vector<8x32xf32>
    %cst_29 = arith.constant 0.000000e+00 : f32
    %70 = vector.broadcast %cst_29 : f32 to vector<8x32xf32>
    %71 = arith.cmpf ogt, %69, %70 : vector<8x32xf32>
    %cst_30 = arith.constant 0.000000e+00 : f32
    %72 = vector.broadcast %cst_30 : f32 to vector<8x32xf32>
    %73 = arith.minimumf %69, %72 : vector<8x32xf32>
    %74 = math.exp %73 : vector<8x32xf32>
    %cst_31 = arith.constant 1.000000e+00 : f32
    %75 = vector.broadcast %cst_31 : f32 to vector<8x32xf32>
    %76 = arith.subf %74, %75 : vector<8x32xf32>
    %77 = arith.select %71, %69, %76 : vector<8x32xi1>, vector<8x32xf32>
    %cst_32 = arith.constant dense<0.000000e+00> : vector<8x32xf32>
    %78 = tpu.matmul %77, %1, %cst_32 {dimension_numbers = #tpu.dot_dimension_numbers<[1], [0], [0], [1], [0, 0, 1, 1], [], []>} : vector<8x32xf32>, vector<32x32xf32>, vector<8x32xf32> -> vector<8x32xf32>
    %79 = arith.addf %78, %9 : vector<8x32xf32>
    %cst_33 = arith.constant 0.000000e+00 : f32
    %80 = vector.broadcast %cst_33 : f32 to vector<8x32xf32>
    %81 = arith.cmpf ogt, %79, %80 : vector<8x32xf32>
    %cst_34 = arith.constant 0.000000e+00 : f32
    %82 = vector.broadcast %cst_34 : f32 to vector<8x32xf32>
    %83 = arith.minimumf %79, %82 : vector<8x32xf32>
    %84 = math.exp %83 : vector<8x32xf32>
    %cst_35 = arith.constant 1.000000e+00 : f32
    %85 = vector.broadcast %cst_35 : f32 to vector<8x32xf32>
    %86 = arith.subf %84, %85 : vector<8x32xf32>
    %87 = arith.select %81, %79, %86 : vector<8x32xi1>, vector<8x32xf32>
    %cst_36 = arith.constant dense<0.000000e+00> : vector<8x8xf32>
    %88 = tpu.matmul %87, %15, %cst_36 {dimension_numbers = #tpu.dot_dimension_numbers<[1], [0], [0], [1], [0, 0, 1, 1], [], []>} : vector<8x32xf32>, vector<32x8xf32>, vector<8x8xf32> -> vector<8x8xf32>
    %89 = arith.addf %67, %88 : vector<8x8xf32>
    %90 = arith.addf %89, %19 : vector<8x8xf32>
    %cst_37 = arith.constant dense<0.000000e+00> : vector<8x32xf32>
    %91 = tpu.matmul %90, %0, %cst_37 {dimension_numbers = #tpu.dot_dimension_numbers<[1], [0], [0], [1], [0, 0, 1, 1], [], []>} : vector<8x8xf32>, vector<8x32xf32>, vector<8x32xf32> -> vector<8x32xf32>
    %92 = arith.addf %91, %6 : vector<8x32xf32>
    %cst_38 = arith.constant 0.000000e+00 : f32
    %93 = vector.broadcast %cst_38 : f32 to vector<8x32xf32>
    %94 = arith.cmpf ogt, %92, %93 : vector<8x32xf32>
    %cst_39 = arith.constant 0.000000e+00 : f32
    %95 = vector.broadcast %cst_39 : f32 to vector<8x32xf32>
    %96 = arith.minimumf %92, %95 : vector<8x32xf32>
    %97 = math.exp %96 : vector<8x32xf32>
    %cst_40 = arith.constant 1.000000e+00 : f32
    %98 = vector.broadcast %cst_40 : f32 to vector<8x32xf32>
    %99 = arith.subf %97, %98 : vector<8x32xf32>
    %100 = arith.select %94, %92, %99 : vector<8x32xi1>, vector<8x32xf32>
    %cst_41 = arith.constant dense<0.000000e+00> : vector<8x32xf32>
    %101 = tpu.matmul %100, %1, %cst_41 {dimension_numbers = #tpu.dot_dimension_numbers<[1], [0], [0], [1], [0, 0, 1, 1], [], []>} : vector<8x32xf32>, vector<32x32xf32>, vector<8x32xf32> -> vector<8x32xf32>
    %102 = arith.addf %101, %9 : vector<8x32xf32>
    %cst_42 = arith.constant 0.000000e+00 : f32
    %103 = vector.broadcast %cst_42 : f32 to vector<8x32xf32>
    %104 = arith.cmpf ogt, %102, %103 : vector<8x32xf32>
    %cst_43 = arith.constant 0.000000e+00 : f32
    %105 = vector.broadcast %cst_43 : f32 to vector<8x32xf32>
    %106 = arith.minimumf %102, %105 : vector<8x32xf32>
    %107 = math.exp %106 : vector<8x32xf32>
    %cst_44 = arith.constant 1.000000e+00 : f32
    %108 = vector.broadcast %cst_44 : f32 to vector<8x32xf32>
    %109 = arith.subf %107, %108 : vector<8x32xf32>
    %110 = arith.select %104, %102, %109 : vector<8x32xi1>, vector<8x32xf32>
    %cst_45 = arith.constant dense<0.000000e+00> : vector<8x8xf32>
    %111 = tpu.matmul %110, %15, %cst_45 {dimension_numbers = #tpu.dot_dimension_numbers<[1], [0], [0], [1], [0, 0, 1, 1], [], []>} : vector<8x32xf32>, vector<32x8xf32>, vector<8x8xf32> -> vector<8x8xf32>
    %112 = arith.addf %90, %111 : vector<8x8xf32>
    %113 = arith.addf %112, %19 : vector<8x8xf32>
    %cst_46 = arith.constant dense<0.000000e+00> : vector<8x32xf32>
    %114 = tpu.matmul %113, %0, %cst_46 {dimension_numbers = #tpu.dot_dimension_numbers<[1], [0], [0], [1], [0, 0, 1, 1], [], []>} : vector<8x8xf32>, vector<8x32xf32>, vector<8x32xf32> -> vector<8x32xf32>
    %115 = arith.addf %114, %6 : vector<8x32xf32>
    %cst_47 = arith.constant 0.000000e+00 : f32
    %116 = vector.broadcast %cst_47 : f32 to vector<8x32xf32>
    %117 = arith.cmpf ogt, %115, %116 : vector<8x32xf32>
    %cst_48 = arith.constant 0.000000e+00 : f32
    %118 = vector.broadcast %cst_48 : f32 to vector<8x32xf32>
    %119 = arith.minimumf %115, %118 : vector<8x32xf32>
    %120 = math.exp %119 : vector<8x32xf32>
    %cst_49 = arith.constant 1.000000e+00 : f32
    %121 = vector.broadcast %cst_49 : f32 to vector<8x32xf32>
    %122 = arith.subf %120, %121 : vector<8x32xf32>
    %123 = arith.select %117, %115, %122 : vector<8x32xi1>, vector<8x32xf32>
    %cst_50 = arith.constant dense<0.000000e+00> : vector<8x32xf32>
    %124 = tpu.matmul %123, %1, %cst_50 {dimension_numbers = #tpu.dot_dimension_numbers<[1], [0], [0], [1], [0, 0, 1, 1], [], []>} : vector<8x32xf32>, vector<32x32xf32>, vector<8x32xf32> -> vector<8x32xf32>
    %125 = arith.addf %124, %9 : vector<8x32xf32>
    %cst_51 = arith.constant 0.000000e+00 : f32
    %126 = vector.broadcast %cst_51 : f32 to vector<8x32xf32>
    %127 = arith.cmpf ogt, %125, %126 : vector<8x32xf32>
    %cst_52 = arith.constant 0.000000e+00 : f32
    %128 = vector.broadcast %cst_52 : f32 to vector<8x32xf32>
    %129 = arith.minimumf %125, %128 : vector<8x32xf32>
    %130 = math.exp %129 : vector<8x32xf32>
    %cst_53 = arith.constant 1.000000e+00 : f32
    %131 = vector.broadcast %cst_53 : f32 to vector<8x32xf32>
    %132 = arith.subf %130, %131 : vector<8x32xf32>
    %133 = arith.select %127, %125, %132 : vector<8x32xi1>, vector<8x32xf32>
    %cst_54 = arith.constant dense<0.000000e+00> : vector<8x8xf32>
    %134 = tpu.matmul %133, %15, %cst_54 {dimension_numbers = #tpu.dot_dimension_numbers<[1], [0], [0], [1], [0, 0, 1, 1], [], []>} : vector<8x32xf32>, vector<32x8xf32>, vector<8x8xf32> -> vector<8x8xf32>
    %135 = arith.addf %113, %134 : vector<8x8xf32>
    %136 = arith.addf %135, %19 : vector<8x8xf32>
    %cst_55 = arith.constant dense<0.000000e+00> : vector<8x32xf32>
    %137 = tpu.matmul %136, %0, %cst_55 {dimension_numbers = #tpu.dot_dimension_numbers<[1], [0], [0], [1], [0, 0, 1, 1], [], []>} : vector<8x8xf32>, vector<8x32xf32>, vector<8x32xf32> -> vector<8x32xf32>
    %138 = arith.addf %137, %6 : vector<8x32xf32>
    %cst_56 = arith.constant 0.000000e+00 : f32
    %139 = vector.broadcast %cst_56 : f32 to vector<8x32xf32>
    %140 = arith.cmpf ogt, %138, %139 : vector<8x32xf32>
    %cst_57 = arith.constant 0.000000e+00 : f32
    %141 = vector.broadcast %cst_57 : f32 to vector<8x32xf32>
    %142 = arith.minimumf %138, %141 : vector<8x32xf32>
    %143 = math.exp %142 : vector<8x32xf32>
    %cst_58 = arith.constant 1.000000e+00 : f32
    %144 = vector.broadcast %cst_58 : f32 to vector<8x32xf32>
    %145 = arith.subf %143, %144 : vector<8x32xf32>
    %146 = arith.select %140, %138, %145 : vector<8x32xi1>, vector<8x32xf32>
    %cst_59 = arith.constant dense<0.000000e+00> : vector<8x32xf32>
    %147 = tpu.matmul %146, %1, %cst_59 {dimension_numbers = #tpu.dot_dimension_numbers<[1], [0], [0], [1], [0, 0, 1, 1], [], []>} : vector<8x32xf32>, vector<32x32xf32>, vector<8x32xf32> -> vector<8x32xf32>
    %148 = arith.addf %147, %9 : vector<8x32xf32>
    %cst_60 = arith.constant 0.000000e+00 : f32
    %149 = vector.broadcast %cst_60 : f32 to vector<8x32xf32>
    %150 = arith.cmpf ogt, %148, %149 : vector<8x32xf32>
    %cst_61 = arith.constant 0.000000e+00 : f32
    %151 = vector.broadcast %cst_61 : f32 to vector<8x32xf32>
    %152 = arith.minimumf %148, %151 : vector<8x32xf32>
    %153 = math.exp %152 : vector<8x32xf32>
    %cst_62 = arith.constant 1.000000e+00 : f32
    %154 = vector.broadcast %cst_62 : f32 to vector<8x32xf32>
    %155 = arith.subf %153, %154 : vector<8x32xf32>
    %156 = arith.select %150, %148, %155 : vector<8x32xi1>, vector<8x32xf32>
    %cst_63 = arith.constant dense<0.000000e+00> : vector<8x8xf32>
    %157 = tpu.matmul %156, %15, %cst_63 {dimension_numbers = #tpu.dot_dimension_numbers<[1], [0], [0], [1], [0, 0, 1, 1], [], []>} : vector<8x32xf32>, vector<32x8xf32>, vector<8x8xf32> -> vector<8x8xf32>
    %158 = arith.addf %136, %157 : vector<8x8xf32>
    %159 = arith.addf %158, %19 : vector<8x8xf32>
    %cst_64 = arith.constant dense<0.000000e+00> : vector<8x32xf32>
    %160 = tpu.matmul %159, %0, %cst_64 {dimension_numbers = #tpu.dot_dimension_numbers<[1], [0], [0], [1], [0, 0, 1, 1], [], []>} : vector<8x8xf32>, vector<8x32xf32>, vector<8x32xf32> -> vector<8x32xf32>
    %161 = arith.addf %160, %6 : vector<8x32xf32>
    %cst_65 = arith.constant 0.000000e+00 : f32
    %162 = vector.broadcast %cst_65 : f32 to vector<8x32xf32>
    %163 = arith.cmpf ogt, %161, %162 : vector<8x32xf32>
    %cst_66 = arith.constant 0.000000e+00 : f32
    %164 = vector.broadcast %cst_66 : f32 to vector<8x32xf32>
    %165 = arith.minimumf %161, %164 : vector<8x32xf32>
    %166 = math.exp %165 : vector<8x32xf32>
    %cst_67 = arith.constant 1.000000e+00 : f32
    %167 = vector.broadcast %cst_67 : f32 to vector<8x32xf32>
    %168 = arith.subf %166, %167 : vector<8x32xf32>
    %169 = arith.select %163, %161, %168 : vector<8x32xi1>, vector<8x32xf32>
    %cst_68 = arith.constant dense<0.000000e+00> : vector<8x32xf32>
    %170 = tpu.matmul %169, %1, %cst_68 {dimension_numbers = #tpu.dot_dimension_numbers<[1], [0], [0], [1], [0, 0, 1, 1], [], []>} : vector<8x32xf32>, vector<32x32xf32>, vector<8x32xf32> -> vector<8x32xf32>
    %171 = arith.addf %170, %9 : vector<8x32xf32>
    %cst_69 = arith.constant 0.000000e+00 : f32
    %172 = vector.broadcast %cst_69 : f32 to vector<8x32xf32>
    %173 = arith.cmpf ogt, %171, %172 : vector<8x32xf32>
    %cst_70 = arith.constant 0.000000e+00 : f32
    %174 = vector.broadcast %cst_70 : f32 to vector<8x32xf32>
    %175 = arith.minimumf %171, %174 : vector<8x32xf32>
    %176 = math.exp %175 : vector<8x32xf32>
    %cst_71 = arith.constant 1.000000e+00 : f32
    %177 = vector.broadcast %cst_71 : f32 to vector<8x32xf32>
    %178 = arith.subf %176, %177 : vector<8x32xf32>
    %179 = arith.select %173, %171, %178 : vector<8x32xi1>, vector<8x32xf32>
    %cst_72 = arith.constant dense<0.000000e+00> : vector<8x8xf32>
    %180 = tpu.matmul %179, %15, %cst_72 {dimension_numbers = #tpu.dot_dimension_numbers<[1], [0], [0], [1], [0, 0, 1, 1], [], []>} : vector<8x32xf32>, vector<32x8xf32>, vector<8x8xf32> -> vector<8x8xf32>
    %181 = arith.addf %159, %180 : vector<8x8xf32>
    %182 = arith.addf %181, %19 : vector<8x8xf32>
    %cst_73 = arith.constant dense<0.000000e+00> : vector<8x32xf32>
    %183 = tpu.matmul %182, %0, %cst_73 {dimension_numbers = #tpu.dot_dimension_numbers<[1], [0], [0], [1], [0, 0, 1, 1], [], []>} : vector<8x8xf32>, vector<8x32xf32>, vector<8x32xf32> -> vector<8x32xf32>
    %184 = arith.addf %183, %6 : vector<8x32xf32>
    %cst_74 = arith.constant 0.000000e+00 : f32
    %185 = vector.broadcast %cst_74 : f32 to vector<8x32xf32>
    %186 = arith.cmpf ogt, %184, %185 : vector<8x32xf32>
    %cst_75 = arith.constant 0.000000e+00 : f32
    %187 = vector.broadcast %cst_75 : f32 to vector<8x32xf32>
    %188 = arith.minimumf %184, %187 : vector<8x32xf32>
    %189 = math.exp %188 : vector<8x32xf32>
    %cst_76 = arith.constant 1.000000e+00 : f32
    %190 = vector.broadcast %cst_76 : f32 to vector<8x32xf32>
    %191 = arith.subf %189, %190 : vector<8x32xf32>
    %192 = arith.select %186, %184, %191 : vector<8x32xi1>, vector<8x32xf32>
    %cst_77 = arith.constant dense<0.000000e+00> : vector<8x32xf32>
    %193 = tpu.matmul %192, %1, %cst_77 {dimension_numbers = #tpu.dot_dimension_numbers<[1], [0], [0], [1], [0, 0, 1, 1], [], []>} : vector<8x32xf32>, vector<32x32xf32>, vector<8x32xf32> -> vector<8x32xf32>
    %194 = arith.addf %193, %9 : vector<8x32xf32>
    %cst_78 = arith.constant 0.000000e+00 : f32
    %195 = vector.broadcast %cst_78 : f32 to vector<8x32xf32>
    %196 = arith.cmpf ogt, %194, %195 : vector<8x32xf32>
    %cst_79 = arith.constant 0.000000e+00 : f32
    %197 = vector.broadcast %cst_79 : f32 to vector<8x32xf32>
    %198 = arith.minimumf %194, %197 : vector<8x32xf32>
    %199 = math.exp %198 : vector<8x32xf32>
    %cst_80 = arith.constant 1.000000e+00 : f32
    %200 = vector.broadcast %cst_80 : f32 to vector<8x32xf32>
    %201 = arith.subf %199, %200 : vector<8x32xf32>
    %202 = arith.select %196, %194, %201 : vector<8x32xi1>, vector<8x32xf32>
    %cst_81 = arith.constant dense<0.000000e+00> : vector<8x8xf32>
    %203 = tpu.matmul %202, %21, %cst_81 {dimension_numbers = #tpu.dot_dimension_numbers<[1], [0], [0], [1], [0, 0, 1, 1], [], []>} : vector<8x32xf32>, vector<32x8xf32>, vector<8x8xf32> -> vector<8x8xf32>
    %204 = arith.addf %182, %203 : vector<8x8xf32>
    %205 = arith.addf %204, %25 : vector<8x8xf32>
    %cst_82 = arith.constant dense<0.000000e+00> : vector<8x32xf32>
    %206 = tpu.matmul %205, %0, %cst_82 {dimension_numbers = #tpu.dot_dimension_numbers<[1], [0], [0], [1], [0, 0, 1, 1], [], []>} : vector<8x8xf32>, vector<8x32xf32>, vector<8x32xf32> -> vector<8x32xf32>
    %207 = arith.addf %206, %6 : vector<8x32xf32>
    %cst_83 = arith.constant 0.000000e+00 : f32
    %208 = vector.broadcast %cst_83 : f32 to vector<8x32xf32>
    %209 = arith.cmpf ogt, %207, %208 : vector<8x32xf32>
    %cst_84 = arith.constant 0.000000e+00 : f32
    %210 = vector.broadcast %cst_84 : f32 to vector<8x32xf32>
    %211 = arith.minimumf %207, %210 : vector<8x32xf32>
    %212 = math.exp %211 : vector<8x32xf32>
    %cst_85 = arith.constant 1.000000e+00 : f32
    %213 = vector.broadcast %cst_85 : f32 to vector<8x32xf32>
    %214 = arith.subf %212, %213 : vector<8x32xf32>
    %215 = arith.select %209, %207, %214 : vector<8x32xi1>, vector<8x32xf32>
    %cst_86 = arith.constant dense<0.000000e+00> : vector<8x32xf32>
    %216 = tpu.matmul %215, %1, %cst_86 {dimension_numbers = #tpu.dot_dimension_numbers<[1], [0], [0], [1], [0, 0, 1, 1], [], []>} : vector<8x32xf32>, vector<32x32xf32>, vector<8x32xf32> -> vector<8x32xf32>
    %217 = arith.addf %216, %9 : vector<8x32xf32>
    %cst_87 = arith.constant 0.000000e+00 : f32
    %218 = vector.broadcast %cst_87 : f32 to vector<8x32xf32>
    %219 = arith.cmpf ogt, %217, %218 : vector<8x32xf32>
    %cst_88 = arith.constant 0.000000e+00 : f32
    %220 = vector.broadcast %cst_88 : f32 to vector<8x32xf32>
    %221 = arith.minimumf %217, %220 : vector<8x32xf32>
    %222 = math.exp %221 : vector<8x32xf32>
    %cst_89 = arith.constant 1.000000e+00 : f32
    %223 = vector.broadcast %cst_89 : f32 to vector<8x32xf32>
    %224 = arith.subf %222, %223 : vector<8x32xf32>
    %225 = arith.select %219, %217, %224 : vector<8x32xi1>, vector<8x32xf32>
    %cst_90 = arith.constant dense<0.000000e+00> : vector<8x8xf32>
    %226 = tpu.matmul %225, %21, %cst_90 {dimension_numbers = #tpu.dot_dimension_numbers<[1], [0], [0], [1], [0, 0, 1, 1], [], []>} : vector<8x32xf32>, vector<32x8xf32>, vector<8x8xf32> -> vector<8x8xf32>
    %227 = arith.addf %205, %226 : vector<8x8xf32>
    %228 = arith.addf %227, %25 : vector<8x8xf32>
    %cst_91 = arith.constant dense<0.000000e+00> : vector<8x32xf32>
    %229 = tpu.matmul %228, %0, %cst_91 {dimension_numbers = #tpu.dot_dimension_numbers<[1], [0], [0], [1], [0, 0, 1, 1], [], []>} : vector<8x8xf32>, vector<8x32xf32>, vector<8x32xf32> -> vector<8x32xf32>
    %230 = arith.addf %229, %6 : vector<8x32xf32>
    %cst_92 = arith.constant 0.000000e+00 : f32
    %231 = vector.broadcast %cst_92 : f32 to vector<8x32xf32>
    %232 = arith.cmpf ogt, %230, %231 : vector<8x32xf32>
    %cst_93 = arith.constant 0.000000e+00 : f32
    %233 = vector.broadcast %cst_93 : f32 to vector<8x32xf32>
    %234 = arith.minimumf %230, %233 : vector<8x32xf32>
    %235 = math.exp %234 : vector<8x32xf32>
    %cst_94 = arith.constant 1.000000e+00 : f32
    %236 = vector.broadcast %cst_94 : f32 to vector<8x32xf32>
    %237 = arith.subf %235, %236 : vector<8x32xf32>
    %238 = arith.select %232, %230, %237 : vector<8x32xi1>, vector<8x32xf32>
    %cst_95 = arith.constant dense<0.000000e+00> : vector<8x32xf32>
    %239 = tpu.matmul %238, %1, %cst_95 {dimension_numbers = #tpu.dot_dimension_numbers<[1], [0], [0], [1], [0, 0, 1, 1], [], []>} : vector<8x32xf32>, vector<32x32xf32>, vector<8x32xf32> -> vector<8x32xf32>
    %240 = arith.addf %239, %9 : vector<8x32xf32>
    %cst_96 = arith.constant 0.000000e+00 : f32
    %241 = vector.broadcast %cst_96 : f32 to vector<8x32xf32>
    %242 = arith.cmpf ogt, %240, %241 : vector<8x32xf32>
    %cst_97 = arith.constant 0.000000e+00 : f32
    %243 = vector.broadcast %cst_97 : f32 to vector<8x32xf32>
    %244 = arith.minimumf %240, %243 : vector<8x32xf32>
    %245 = math.exp %244 : vector<8x32xf32>
    %cst_98 = arith.constant 1.000000e+00 : f32
    %246 = vector.broadcast %cst_98 : f32 to vector<8x32xf32>
    %247 = arith.subf %245, %246 : vector<8x32xf32>
    %248 = arith.select %242, %240, %247 : vector<8x32xi1>, vector<8x32xf32>
    %cst_99 = arith.constant dense<0.000000e+00> : vector<8x8xf32>
    %249 = tpu.matmul %248, %21, %cst_99 {dimension_numbers = #tpu.dot_dimension_numbers<[1], [0], [0], [1], [0, 0, 1, 1], [], []>} : vector<8x32xf32>, vector<32x8xf32>, vector<8x8xf32> -> vector<8x8xf32>
    %250 = arith.addf %228, %249 : vector<8x8xf32>
    %251 = arith.addf %250, %25 : vector<8x8xf32>
    %cst_100 = arith.constant dense<0.000000e+00> : vector<8x32xf32>
    %252 = tpu.matmul %251, %0, %cst_100 {dimension_numbers = #tpu.dot_dimension_numbers<[1], [0], [0], [1], [0, 0, 1, 1], [], []>} : vector<8x8xf32>, vector<8x32xf32>, vector<8x32xf32> -> vector<8x32xf32>
    %253 = arith.addf %252, %6 : vector<8x32xf32>
    %cst_101 = arith.constant 0.000000e+00 : f32
    %254 = vector.broadcast %cst_101 : f32 to vector<8x32xf32>
    %255 = arith.cmpf ogt, %253, %254 : vector<8x32xf32>
    %cst_102 = arith.constant 0.000000e+00 : f32
    %256 = vector.broadcast %cst_102 : f32 to vector<8x32xf32>
    %257 = arith.minimumf %253, %256 : vector<8x32xf32>
    %258 = math.exp %257 : vector<8x32xf32>
    %cst_103 = arith.constant 1.000000e+00 : f32
    %259 = vector.broadcast %cst_103 : f32 to vector<8x32xf32>
    %260 = arith.subf %258, %259 : vector<8x32xf32>
    %261 = arith.select %255, %253, %260 : vector<8x32xi1>, vector<8x32xf32>
    %cst_104 = arith.constant dense<0.000000e+00> : vector<8x32xf32>
    %262 = tpu.matmul %261, %1, %cst_104 {dimension_numbers = #tpu.dot_dimension_numbers<[1], [0], [0], [1], [0, 0, 1, 1], [], []>} : vector<8x32xf32>, vector<32x32xf32>, vector<8x32xf32> -> vector<8x32xf32>
    %263 = arith.addf %262, %9 : vector<8x32xf32>
    %cst_105 = arith.constant 0.000000e+00 : f32
    %264 = vector.broadcast %cst_105 : f32 to vector<8x32xf32>
    %265 = arith.cmpf ogt, %263, %264 : vector<8x32xf32>
    %cst_106 = arith.constant 0.000000e+00 : f32
    %266 = vector.broadcast %cst_106 : f32 to vector<8x32xf32>
    %267 = arith.minimumf %263, %266 : vector<8x32xf32>
    %268 = math.exp %267 : vector<8x32xf32>
    %cst_107 = arith.constant 1.000000e+00 : f32
    %269 = vector.broadcast %cst_107 : f32 to vector<8x32xf32>
    %270 = arith.subf %268, %269 : vector<8x32xf32>
    %271 = arith.select %265, %263, %270 : vector<8x32xi1>, vector<8x32xf32>
    %cst_108 = arith.constant dense<0.000000e+00> : vector<8x8xf32>
    %272 = tpu.matmul %271, %27, %cst_108 {dimension_numbers = #tpu.dot_dimension_numbers<[1], [0], [0], [1], [0, 0, 1, 1], [], []>} : vector<8x32xf32>, vector<32x8xf32>, vector<8x8xf32> -> vector<8x8xf32>
    %273 = arith.addf %251, %272 : vector<8x8xf32>
    %274 = arith.addf %273, %31 : vector<8x8xf32>
    %cst_109 = arith.constant dense<0.000000e+00> : vector<8x32xf32>
    %275 = tpu.matmul %274, %0, %cst_109 {dimension_numbers = #tpu.dot_dimension_numbers<[1], [0], [0], [1], [0, 0, 1, 1], [], []>} : vector<8x8xf32>, vector<8x32xf32>, vector<8x32xf32> -> vector<8x32xf32>
    %276 = arith.addf %275, %6 : vector<8x32xf32>
    %cst_110 = arith.constant 0.000000e+00 : f32
    %277 = vector.broadcast %cst_110 : f32 to vector<8x32xf32>
    %278 = arith.cmpf ogt, %276, %277 : vector<8x32xf32>
    %cst_111 = arith.constant 0.000000e+00 : f32
    %279 = vector.broadcast %cst_111 : f32 to vector<8x32xf32>
    %280 = arith.minimumf %276, %279 : vector<8x32xf32>
    %281 = math.exp %280 : vector<8x32xf32>
    %cst_112 = arith.constant 1.000000e+00 : f32
    %282 = vector.broadcast %cst_112 : f32 to vector<8x32xf32>
    %283 = arith.subf %281, %282 : vector<8x32xf32>
    %284 = arith.select %278, %276, %283 : vector<8x32xi1>, vector<8x32xf32>
    %cst_113 = arith.constant dense<0.000000e+00> : vector<8x32xf32>
    %285 = tpu.matmul %284, %1, %cst_113 {dimension_numbers = #tpu.dot_dimension_numbers<[1], [0], [0], [1], [0, 0, 1, 1], [], []>} : vector<8x32xf32>, vector<32x32xf32>, vector<8x32xf32> -> vector<8x32xf32>
    %286 = arith.addf %285, %9 : vector<8x32xf32>
    %cst_114 = arith.constant 0.000000e+00 : f32
    %287 = vector.broadcast %cst_114 : f32 to vector<8x32xf32>
    %288 = arith.cmpf ogt, %286, %287 : vector<8x32xf32>
    %cst_115 = arith.constant 0.000000e+00 : f32
    %289 = vector.broadcast %cst_115 : f32 to vector<8x32xf32>
    %290 = arith.minimumf %286, %289 : vector<8x32xf32>
    %291 = math.exp %290 : vector<8x32xf32>
    %cst_116 = arith.constant 1.000000e+00 : f32
    %292 = vector.broadcast %cst_116 : f32 to vector<8x32xf32>
    %293 = arith.subf %291, %292 : vector<8x32xf32>
    %294 = arith.select %288, %286, %293 : vector<8x32xi1>, vector<8x32xf32>
    %cst_117 = arith.constant dense<0.000000e+00> : vector<8x8xf32>
    %295 = tpu.matmul %294, %27, %cst_117 {dimension_numbers = #tpu.dot_dimension_numbers<[1], [0], [0], [1], [0, 0, 1, 1], [], []>} : vector<8x32xf32>, vector<32x8xf32>, vector<8x8xf32> -> vector<8x8xf32>
    %296 = arith.addf %274, %295 : vector<8x8xf32>
    %297 = arith.addf %296, %31 : vector<8x8xf32>
    %cst_118 = arith.constant dense<0.000000e+00> : vector<8x32xf32>
    %298 = tpu.matmul %297, %0, %cst_118 {dimension_numbers = #tpu.dot_dimension_numbers<[1], [0], [0], [1], [0, 0, 1, 1], [], []>} : vector<8x8xf32>, vector<8x32xf32>, vector<8x32xf32> -> vector<8x32xf32>
    %299 = arith.addf %298, %6 : vector<8x32xf32>
    %cst_119 = arith.constant 0.000000e+00 : f32
    %300 = vector.broadcast %cst_119 : f32 to vector<8x32xf32>
    %301 = arith.cmpf ogt, %299, %300 : vector<8x32xf32>
    %cst_120 = arith.constant 0.000000e+00 : f32
    %302 = vector.broadcast %cst_120 : f32 to vector<8x32xf32>
    %303 = arith.minimumf %299, %302 : vector<8x32xf32>
    %304 = math.exp %303 : vector<8x32xf32>
    %cst_121 = arith.constant 1.000000e+00 : f32
    %305 = vector.broadcast %cst_121 : f32 to vector<8x32xf32>
    %306 = arith.subf %304, %305 : vector<8x32xf32>
    %307 = arith.select %301, %299, %306 : vector<8x32xi1>, vector<8x32xf32>
    %cst_122 = arith.constant dense<0.000000e+00> : vector<8x32xf32>
    %308 = tpu.matmul %307, %1, %cst_122 {dimension_numbers = #tpu.dot_dimension_numbers<[1], [0], [0], [1], [0, 0, 1, 1], [], []>} : vector<8x32xf32>, vector<32x32xf32>, vector<8x32xf32> -> vector<8x32xf32>
    %309 = arith.addf %308, %9 : vector<8x32xf32>
    %cst_123 = arith.constant 0.000000e+00 : f32
    %310 = vector.broadcast %cst_123 : f32 to vector<8x32xf32>
    %311 = arith.cmpf ogt, %309, %310 : vector<8x32xf32>
    %cst_124 = arith.constant 0.000000e+00 : f32
    %312 = vector.broadcast %cst_124 : f32 to vector<8x32xf32>
    %313 = arith.minimumf %309, %312 : vector<8x32xf32>
    %314 = math.exp %313 : vector<8x32xf32>
    %cst_125 = arith.constant 1.000000e+00 : f32
    %315 = vector.broadcast %cst_125 : f32 to vector<8x32xf32>
    %316 = arith.subf %314, %315 : vector<8x32xf32>
    %317 = arith.select %311, %309, %316 : vector<8x32xi1>, vector<8x32xf32>
    %cst_126 = arith.constant dense<0.000000e+00> : vector<8x8xf32>
    %318 = tpu.matmul %317, %27, %cst_126 {dimension_numbers = #tpu.dot_dimension_numbers<[1], [0], [0], [1], [0, 0, 1, 1], [], []>} : vector<8x32xf32>, vector<32x8xf32>, vector<8x8xf32> -> vector<8x8xf32>
    %319 = arith.addf %297, %318 : vector<8x8xf32>
    %320 = arith.addf %319, %31 : vector<8x8xf32>
    %cst_127 = arith.constant dense<0.000000e+00> : vector<8x32xf32>
    %321 = tpu.matmul %320, %0, %cst_127 {dimension_numbers = #tpu.dot_dimension_numbers<[1], [0], [0], [1], [0, 0, 1, 1], [], []>} : vector<8x8xf32>, vector<8x32xf32>, vector<8x32xf32> -> vector<8x32xf32>
    %322 = arith.addf %321, %6 : vector<8x32xf32>
    %cst_128 = arith.constant 0.000000e+00 : f32
    %323 = vector.broadcast %cst_128 : f32 to vector<8x32xf32>
    %324 = arith.cmpf ogt, %322, %323 : vector<8x32xf32>
    %cst_129 = arith.constant 0.000000e+00 : f32
    %325 = vector.broadcast %cst_129 : f32 to vector<8x32xf32>
    %326 = arith.minimumf %322, %325 : vector<8x32xf32>
    %327 = math.exp %326 : vector<8x32xf32>
    %cst_130 = arith.constant 1.000000e+00 : f32
    %328 = vector.broadcast %cst_130 : f32 to vector<8x32xf32>
    %329 = arith.subf %327, %328 : vector<8x32xf32>
    %330 = arith.select %324, %322, %329 : vector<8x32xi1>, vector<8x32xf32>
    %cst_131 = arith.constant dense<0.000000e+00> : vector<8x32xf32>
    %331 = tpu.matmul %330, %1, %cst_131 {dimension_numbers = #tpu.dot_dimension_numbers<[1], [0], [0], [1], [0, 0, 1, 1], [], []>} : vector<8x32xf32>, vector<32x32xf32>, vector<8x32xf32> -> vector<8x32xf32>
    %332 = arith.addf %331, %9 : vector<8x32xf32>
    %cst_132 = arith.constant 0.000000e+00 : f32
    %333 = vector.broadcast %cst_132 : f32 to vector<8x32xf32>
    %334 = arith.cmpf ogt, %332, %333 : vector<8x32xf32>
    %cst_133 = arith.constant 0.000000e+00 : f32
    %335 = vector.broadcast %cst_133 : f32 to vector<8x32xf32>
    %336 = arith.minimumf %332, %335 : vector<8x32xf32>
    %337 = math.exp %336 : vector<8x32xf32>
    %cst_134 = arith.constant 1.000000e+00 : f32
    %338 = vector.broadcast %cst_134 : f32 to vector<8x32xf32>
    %339 = arith.subf %337, %338 : vector<8x32xf32>
    %340 = arith.select %334, %332, %339 : vector<8x32xi1>, vector<8x32xf32>
    %cst_135 = arith.constant dense<0.000000e+00> : vector<8x8xf32>
    %341 = tpu.matmul %340, %27, %cst_135 {dimension_numbers = #tpu.dot_dimension_numbers<[1], [0], [0], [1], [0, 0, 1, 1], [], []>} : vector<8x32xf32>, vector<32x8xf32>, vector<8x8xf32> -> vector<8x8xf32>
    %342 = arith.addf %320, %341 : vector<8x8xf32>
    %343 = arith.addf %342, %31 : vector<8x8xf32>
    %cst_136 = arith.constant dense<0.000000e+00> : vector<8x32xf32>
    %344 = tpu.matmul %343, %0, %cst_136 {dimension_numbers = #tpu.dot_dimension_numbers<[1], [0], [0], [1], [0, 0, 1, 1], [], []>} : vector<8x8xf32>, vector<8x32xf32>, vector<8x32xf32> -> vector<8x32xf32>
    %345 = arith.addf %344, %6 : vector<8x32xf32>
    %cst_137 = arith.constant 0.000000e+00 : f32
    %346 = vector.broadcast %cst_137 : f32 to vector<8x32xf32>
    %347 = arith.cmpf ogt, %345, %346 : vector<8x32xf32>
    %cst_138 = arith.constant 0.000000e+00 : f32
    %348 = vector.broadcast %cst_138 : f32 to vector<8x32xf32>
    %349 = arith.minimumf %345, %348 : vector<8x32xf32>
    %350 = math.exp %349 : vector<8x32xf32>
    %cst_139 = arith.constant 1.000000e+00 : f32
    %351 = vector.broadcast %cst_139 : f32 to vector<8x32xf32>
    %352 = arith.subf %350, %351 : vector<8x32xf32>
    %353 = arith.select %347, %345, %352 : vector<8x32xi1>, vector<8x32xf32>
    %cst_140 = arith.constant dense<0.000000e+00> : vector<8x32xf32>
    %354 = tpu.matmul %353, %1, %cst_140 {dimension_numbers = #tpu.dot_dimension_numbers<[1], [0], [0], [1], [0, 0, 1, 1], [], []>} : vector<8x32xf32>, vector<32x32xf32>, vector<8x32xf32> -> vector<8x32xf32>
    %355 = arith.addf %354, %9 : vector<8x32xf32>
    %cst_141 = arith.constant 0.000000e+00 : f32
    %356 = vector.broadcast %cst_141 : f32 to vector<8x32xf32>
    %357 = arith.cmpf ogt, %355, %356 : vector<8x32xf32>
    %cst_142 = arith.constant 0.000000e+00 : f32
    %358 = vector.broadcast %cst_142 : f32 to vector<8x32xf32>
    %359 = arith.minimumf %355, %358 : vector<8x32xf32>
    %360 = math.exp %359 : vector<8x32xf32>
    %cst_143 = arith.constant 1.000000e+00 : f32
    %361 = vector.broadcast %cst_143 : f32 to vector<8x32xf32>
    %362 = arith.subf %360, %361 : vector<8x32xf32>
    %363 = arith.select %357, %355, %362 : vector<8x32xi1>, vector<8x32xf32>
    %cst_144 = arith.constant dense<0.000000e+00> : vector<8x8xf32>
    %364 = tpu.matmul %363, %27, %cst_144 {dimension_numbers = #tpu.dot_dimension_numbers<[1], [0], [0], [1], [0, 0, 1, 1], [], []>} : vector<8x32xf32>, vector<32x8xf32>, vector<8x8xf32> -> vector<8x8xf32>
    %365 = arith.addf %343, %364 : vector<8x8xf32>
    %366 = arith.addf %365, %31 : vector<8x8xf32>
    %cst_145 = arith.constant dense<0.000000e+00> : vector<8x32xf32>
    %367 = tpu.matmul %366, %0, %cst_145 {dimension_numbers = #tpu.dot_dimension_numbers<[1], [0], [0], [1], [0, 0, 1, 1], [], []>} : vector<8x8xf32>, vector<8x32xf32>, vector<8x32xf32> -> vector<8x32xf32>
    %368 = arith.addf %367, %6 : vector<8x32xf32>
    %cst_146 = arith.constant 0.000000e+00 : f32
    %369 = vector.broadcast %cst_146 : f32 to vector<8x32xf32>
    %370 = arith.cmpf ogt, %368, %369 : vector<8x32xf32>
    %cst_147 = arith.constant 0.000000e+00 : f32
    %371 = vector.broadcast %cst_147 : f32 to vector<8x32xf32>
    %372 = arith.minimumf %368, %371 : vector<8x32xf32>
    %373 = math.exp %372 : vector<8x32xf32>
    %cst_148 = arith.constant 1.000000e+00 : f32
    %374 = vector.broadcast %cst_148 : f32 to vector<8x32xf32>
    %375 = arith.subf %373, %374 : vector<8x32xf32>
    %376 = arith.select %370, %368, %375 : vector<8x32xi1>, vector<8x32xf32>
    %cst_149 = arith.constant dense<0.000000e+00> : vector<8x32xf32>
    %377 = tpu.matmul %376, %1, %cst_149 {dimension_numbers = #tpu.dot_dimension_numbers<[1], [0], [0], [1], [0, 0, 1, 1], [], []>} : vector<8x32xf32>, vector<32x32xf32>, vector<8x32xf32> -> vector<8x32xf32>
    %378 = arith.addf %377, %9 : vector<8x32xf32>
    %cst_150 = arith.constant 0.000000e+00 : f32
    %379 = vector.broadcast %cst_150 : f32 to vector<8x32xf32>
    %380 = arith.cmpf ogt, %378, %379 : vector<8x32xf32>
    %cst_151 = arith.constant 0.000000e+00 : f32
    %381 = vector.broadcast %cst_151 : f32 to vector<8x32xf32>
    %382 = arith.minimumf %378, %381 : vector<8x32xf32>
    %383 = math.exp %382 : vector<8x32xf32>
    %cst_152 = arith.constant 1.000000e+00 : f32
    %384 = vector.broadcast %cst_152 : f32 to vector<8x32xf32>
    %385 = arith.subf %383, %384 : vector<8x32xf32>
    %386 = arith.select %380, %378, %385 : vector<8x32xi1>, vector<8x32xf32>
    %cst_153 = arith.constant dense<0.000000e+00> : vector<8x8xf32>
    %387 = tpu.matmul %386, %27, %cst_153 {dimension_numbers = #tpu.dot_dimension_numbers<[1], [0], [0], [1], [0, 0, 1, 1], [], []>} : vector<8x32xf32>, vector<32x8xf32>, vector<8x8xf32> -> vector<8x8xf32>
    %388 = arith.addf %366, %387 : vector<8x8xf32>
    %389 = arith.addf %388, %31 : vector<8x8xf32>
    %cst_154 = arith.constant dense<0.000000e+00> : vector<8x32xf32>
    %390 = tpu.matmul %389, %0, %cst_154 {dimension_numbers = #tpu.dot_dimension_numbers<[1], [0], [0], [1], [0, 0, 1, 1], [], []>} : vector<8x8xf32>, vector<8x32xf32>, vector<8x32xf32> -> vector<8x32xf32>
    %391 = arith.addf %390, %6 : vector<8x32xf32>
    %cst_155 = arith.constant 0.000000e+00 : f32
    %392 = vector.broadcast %cst_155 : f32 to vector<8x32xf32>
    %393 = arith.cmpf ogt, %391, %392 : vector<8x32xf32>
    %cst_156 = arith.constant 0.000000e+00 : f32
    %394 = vector.broadcast %cst_156 : f32 to vector<8x32xf32>
    %395 = arith.minimumf %391, %394 : vector<8x32xf32>
    %396 = math.exp %395 : vector<8x32xf32>
    %cst_157 = arith.constant 1.000000e+00 : f32
    %397 = vector.broadcast %cst_157 : f32 to vector<8x32xf32>
    %398 = arith.subf %396, %397 : vector<8x32xf32>
    %399 = arith.select %393, %391, %398 : vector<8x32xi1>, vector<8x32xf32>
    %cst_158 = arith.constant dense<0.000000e+00> : vector<8x32xf32>
    %400 = tpu.matmul %399, %1, %cst_158 {dimension_numbers = #tpu.dot_dimension_numbers<[1], [0], [0], [1], [0, 0, 1, 1], [], []>} : vector<8x32xf32>, vector<32x32xf32>, vector<8x32xf32> -> vector<8x32xf32>
    %401 = arith.addf %400, %9 : vector<8x32xf32>
    %cst_159 = arith.constant 0.000000e+00 : f32
    %402 = vector.broadcast %cst_159 : f32 to vector<8x32xf32>
    %403 = arith.cmpf ogt, %401, %402 : vector<8x32xf32>
    %cst_160 = arith.constant 0.000000e+00 : f32
    %404 = vector.broadcast %cst_160 : f32 to vector<8x32xf32>
    %405 = arith.minimumf %401, %404 : vector<8x32xf32>
    %406 = math.exp %405 : vector<8x32xf32>
    %cst_161 = arith.constant 1.000000e+00 : f32
    %407 = vector.broadcast %cst_161 : f32 to vector<8x32xf32>
    %408 = arith.subf %406, %407 : vector<8x32xf32>
    %409 = arith.select %403, %401, %408 : vector<8x32xi1>, vector<8x32xf32>
    %cst_162 = arith.constant dense<0.000000e+00> : vector<8x8xf32>
    %410 = tpu.matmul %409, %33, %cst_162 {dimension_numbers = #tpu.dot_dimension_numbers<[1], [0], [0], [1], [0, 0, 1, 1], [], []>} : vector<8x32xf32>, vector<32x8xf32>, vector<8x8xf32> -> vector<8x8xf32>
    %411 = arith.addf %389, %410 : vector<8x8xf32>
    %412 = arith.addf %411, %37 : vector<8x8xf32>
    %cst_163 = arith.constant dense<0.000000e+00> : vector<8x32xf32>
    %413 = tpu.matmul %412, %0, %cst_163 {dimension_numbers = #tpu.dot_dimension_numbers<[1], [0], [0], [1], [0, 0, 1, 1], [], []>} : vector<8x8xf32>, vector<8x32xf32>, vector<8x32xf32> -> vector<8x32xf32>
    %414 = arith.addf %413, %6 : vector<8x32xf32>
    %cst_164 = arith.constant 0.000000e+00 : f32
    %415 = vector.broadcast %cst_164 : f32 to vector<8x32xf32>
    %416 = arith.cmpf ogt, %414, %415 : vector<8x32xf32>
    %cst_165 = arith.constant 0.000000e+00 : f32
    %417 = vector.broadcast %cst_165 : f32 to vector<8x32xf32>
    %418 = arith.minimumf %414, %417 : vector<8x32xf32>
    %419 = math.exp %418 : vector<8x32xf32>
    %cst_166 = arith.constant 1.000000e+00 : f32
    %420 = vector.broadcast %cst_166 : f32 to vector<8x32xf32>
    %421 = arith.subf %419, %420 : vector<8x32xf32>
    %422 = arith.select %416, %414, %421 : vector<8x32xi1>, vector<8x32xf32>
    %cst_167 = arith.constant dense<0.000000e+00> : vector<8x32xf32>
    %423 = tpu.matmul %422, %1, %cst_167 {dimension_numbers = #tpu.dot_dimension_numbers<[1], [0], [0], [1], [0, 0, 1, 1], [], []>} : vector<8x32xf32>, vector<32x32xf32>, vector<8x32xf32> -> vector<8x32xf32>
    %424 = arith.addf %423, %9 : vector<8x32xf32>
    %cst_168 = arith.constant 0.000000e+00 : f32
    %425 = vector.broadcast %cst_168 : f32 to vector<8x32xf32>
    %426 = arith.cmpf ogt, %424, %425 : vector<8x32xf32>
    %cst_169 = arith.constant 0.000000e+00 : f32
    %427 = vector.broadcast %cst_169 : f32 to vector<8x32xf32>
    %428 = arith.minimumf %424, %427 : vector<8x32xf32>
    %429 = math.exp %428 : vector<8x32xf32>
    %cst_170 = arith.constant 1.000000e+00 : f32
    %430 = vector.broadcast %cst_170 : f32 to vector<8x32xf32>
    %431 = arith.subf %429, %430 : vector<8x32xf32>
    %432 = arith.select %426, %424, %431 : vector<8x32xi1>, vector<8x32xf32>
    %cst_171 = arith.constant dense<0.000000e+00> : vector<8x8xf32>
    %433 = tpu.matmul %432, %33, %cst_171 {dimension_numbers = #tpu.dot_dimension_numbers<[1], [0], [0], [1], [0, 0, 1, 1], [], []>} : vector<8x32xf32>, vector<32x8xf32>, vector<8x8xf32> -> vector<8x8xf32>
    %434 = arith.addf %412, %433 : vector<8x8xf32>
    %435 = arith.addf %434, %37 : vector<8x8xf32>
    %cst_172 = arith.constant dense<0.000000e+00> : vector<8x32xf32>
    %436 = tpu.matmul %435, %0, %cst_172 {dimension_numbers = #tpu.dot_dimension_numbers<[1], [0], [0], [1], [0, 0, 1, 1], [], []>} : vector<8x8xf32>, vector<8x32xf32>, vector<8x32xf32> -> vector<8x32xf32>
    %437 = arith.addf %436, %6 : vector<8x32xf32>
    %cst_173 = arith.constant 0.000000e+00 : f32
    %438 = vector.broadcast %cst_173 : f32 to vector<8x32xf32>
    %439 = arith.cmpf ogt, %437, %438 : vector<8x32xf32>
    %cst_174 = arith.constant 0.000000e+00 : f32
    %440 = vector.broadcast %cst_174 : f32 to vector<8x32xf32>
    %441 = arith.minimumf %437, %440 : vector<8x32xf32>
    %442 = math.exp %441 : vector<8x32xf32>
    %cst_175 = arith.constant 1.000000e+00 : f32
    %443 = vector.broadcast %cst_175 : f32 to vector<8x32xf32>
    %444 = arith.subf %442, %443 : vector<8x32xf32>
    %445 = arith.select %439, %437, %444 : vector<8x32xi1>, vector<8x32xf32>
    %cst_176 = arith.constant dense<0.000000e+00> : vector<8x32xf32>
    %446 = tpu.matmul %445, %1, %cst_176 {dimension_numbers = #tpu.dot_dimension_numbers<[1], [0], [0], [1], [0, 0, 1, 1], [], []>} : vector<8x32xf32>, vector<32x32xf32>, vector<8x32xf32> -> vector<8x32xf32>
    %447 = arith.addf %446, %9 : vector<8x32xf32>
    %cst_177 = arith.constant 0.000000e+00 : f32
    %448 = vector.broadcast %cst_177 : f32 to vector<8x32xf32>
    %449 = arith.cmpf ogt, %447, %448 : vector<8x32xf32>
    %cst_178 = arith.constant 0.000000e+00 : f32
    %450 = vector.broadcast %cst_178 : f32 to vector<8x32xf32>
    %451 = arith.minimumf %447, %450 : vector<8x32xf32>
    %452 = math.exp %451 : vector<8x32xf32>
    %cst_179 = arith.constant 1.000000e+00 : f32
    %453 = vector.broadcast %cst_179 : f32 to vector<8x32xf32>
    %454 = arith.subf %452, %453 : vector<8x32xf32>
    %455 = arith.select %449, %447, %454 : vector<8x32xi1>, vector<8x32xf32>
    %cst_180 = arith.constant dense<0.000000e+00> : vector<8x8xf32>
    %456 = tpu.matmul %455, %33, %cst_180 {dimension_numbers = #tpu.dot_dimension_numbers<[1], [0], [0], [1], [0, 0, 1, 1], [], []>} : vector<8x32xf32>, vector<32x8xf32>, vector<8x8xf32> -> vector<8x8xf32>
    %457 = arith.addf %435, %456 : vector<8x8xf32>
    %458 = arith.addf %457, %37 : vector<8x8xf32>
    %cst_181 = arith.constant dense<0.000000e+00> : vector<8x32xf32>
    %459 = tpu.matmul %458, %0, %cst_181 {dimension_numbers = #tpu.dot_dimension_numbers<[1], [0], [0], [1], [0, 0, 1, 1], [], []>} : vector<8x8xf32>, vector<8x32xf32>, vector<8x32xf32> -> vector<8x32xf32>
    %460 = arith.addf %459, %6 : vector<8x32xf32>
    %cst_182 = arith.constant 0.000000e+00 : f32
    %461 = vector.broadcast %cst_182 : f32 to vector<8x32xf32>
    %462 = arith.cmpf ogt, %460, %461 : vector<8x32xf32>
    %cst_183 = arith.constant 0.000000e+00 : f32
    %463 = vector.broadcast %cst_183 : f32 to vector<8x32xf32>
    %464 = arith.minimumf %460, %463 : vector<8x32xf32>
    %465 = math.exp %464 : vector<8x32xf32>
    %cst_184 = arith.constant 1.000000e+00 : f32
    %466 = vector.broadcast %cst_184 : f32 to vector<8x32xf32>
    %467 = arith.subf %465, %466 : vector<8x32xf32>
    %468 = arith.select %462, %460, %467 : vector<8x32xi1>, vector<8x32xf32>
    %cst_185 = arith.constant dense<0.000000e+00> : vector<8x32xf32>
    %469 = tpu.matmul %468, %1, %cst_185 {dimension_numbers = #tpu.dot_dimension_numbers<[1], [0], [0], [1], [0, 0, 1, 1], [], []>} : vector<8x32xf32>, vector<32x32xf32>, vector<8x32xf32> -> vector<8x32xf32>
    %470 = arith.addf %469, %9 : vector<8x32xf32>
    %cst_186 = arith.constant 0.000000e+00 : f32
    %471 = vector.broadcast %cst_186 : f32 to vector<8x32xf32>
    %472 = arith.cmpf ogt, %470, %471 : vector<8x32xf32>
    %cst_187 = arith.constant 0.000000e+00 : f32
    %473 = vector.broadcast %cst_187 : f32 to vector<8x32xf32>
    %474 = arith.minimumf %470, %473 : vector<8x32xf32>
    %475 = math.exp %474 : vector<8x32xf32>
    %cst_188 = arith.constant 1.000000e+00 : f32
    %476 = vector.broadcast %cst_188 : f32 to vector<8x32xf32>
    %477 = arith.subf %475, %476 : vector<8x32xf32>
    %478 = arith.select %472, %470, %477 : vector<8x32xi1>, vector<8x32xf32>
    %cst_189 = arith.constant dense<0.000000e+00> : vector<8x8xf32>
    %479 = tpu.matmul %478, %39, %cst_189 {dimension_numbers = #tpu.dot_dimension_numbers<[1], [0], [0], [1], [0, 0, 1, 1], [], []>} : vector<8x32xf32>, vector<32x8xf32>, vector<8x8xf32> -> vector<8x8xf32>
    %480 = arith.addf %458, %479 : vector<8x8xf32>
    %481 = arith.addf %480, %43 : vector<8x8xf32>
    %cst_190 = arith.constant dense<0.000000e+00> : vector<8x32xf32>
    %482 = tpu.matmul %481, %0, %cst_190 {dimension_numbers = #tpu.dot_dimension_numbers<[1], [0], [0], [1], [0, 0, 1, 1], [], []>} : vector<8x8xf32>, vector<8x32xf32>, vector<8x32xf32> -> vector<8x32xf32>
    %483 = arith.addf %482, %6 : vector<8x32xf32>
    %cst_191 = arith.constant 0.000000e+00 : f32
    %484 = vector.broadcast %cst_191 : f32 to vector<8x32xf32>
    %485 = arith.cmpf ogt, %483, %484 : vector<8x32xf32>
    %cst_192 = arith.constant 0.000000e+00 : f32
    %486 = vector.broadcast %cst_192 : f32 to vector<8x32xf32>
    %487 = arith.minimumf %483, %486 : vector<8x32xf32>
    %488 = math.exp %487 : vector<8x32xf32>
    %cst_193 = arith.constant 1.000000e+00 : f32
    %489 = vector.broadcast %cst_193 : f32 to vector<8x32xf32>
    %490 = arith.subf %488, %489 : vector<8x32xf32>
    %491 = arith.select %485, %483, %490 : vector<8x32xi1>, vector<8x32xf32>
    %cst_194 = arith.constant dense<0.000000e+00> : vector<8x32xf32>
    %492 = tpu.matmul %491, %1, %cst_194 {dimension_numbers = #tpu.dot_dimension_numbers<[1], [0], [0], [1], [0, 0, 1, 1], [], []>} : vector<8x32xf32>, vector<32x32xf32>, vector<8x32xf32> -> vector<8x32xf32>
    %493 = arith.addf %492, %9 : vector<8x32xf32>
    %cst_195 = arith.constant 0.000000e+00 : f32
    %494 = vector.broadcast %cst_195 : f32 to vector<8x32xf32>
    %495 = arith.cmpf ogt, %493, %494 : vector<8x32xf32>
    %cst_196 = arith.constant 0.000000e+00 : f32
    %496 = vector.broadcast %cst_196 : f32 to vector<8x32xf32>
    %497 = arith.minimumf %493, %496 : vector<8x32xf32>
    %498 = math.exp %497 : vector<8x32xf32>
    %cst_197 = arith.constant 1.000000e+00 : f32
    %499 = vector.broadcast %cst_197 : f32 to vector<8x32xf32>
    %500 = arith.subf %498, %499 : vector<8x32xf32>
    %501 = arith.select %495, %493, %500 : vector<8x32xi1>, vector<8x32xf32>
    %cst_198 = arith.constant dense<0.000000e+00> : vector<8x8xf32>
    %502 = tpu.matmul %501, %39, %cst_198 {dimension_numbers = #tpu.dot_dimension_numbers<[1], [0], [0], [1], [0, 0, 1, 1], [], []>} : vector<8x32xf32>, vector<32x8xf32>, vector<8x8xf32> -> vector<8x8xf32>
    %503 = arith.addf %481, %502 : vector<8x8xf32>
    %504 = arith.addf %503, %43 : vector<8x8xf32>
    %cst_199 = arith.constant dense<0.000000e+00> : vector<8x32xf32>
    %505 = tpu.matmul %504, %0, %cst_199 {dimension_numbers = #tpu.dot_dimension_numbers<[1], [0], [0], [1], [0, 0, 1, 1], [], []>} : vector<8x8xf32>, vector<8x32xf32>, vector<8x32xf32> -> vector<8x32xf32>
    %506 = arith.addf %505, %6 : vector<8x32xf32>
    %cst_200 = arith.constant 0.000000e+00 : f32
    %507 = vector.broadcast %cst_200 : f32 to vector<8x32xf32>
    %508 = arith.cmpf ogt, %506, %507 : vector<8x32xf32>
    %cst_201 = arith.constant 0.000000e+00 : f32
    %509 = vector.broadcast %cst_201 : f32 to vector<8x32xf32>
    %510 = arith.minimumf %506, %509 : vector<8x32xf32>
    %511 = math.exp %510 : vector<8x32xf32>
    %cst_202 = arith.constant 1.000000e+00 : f32
    %512 = vector.broadcast %cst_202 : f32 to vector<8x32xf32>
    %513 = arith.subf %511, %512 : vector<8x32xf32>
    %514 = arith.select %508, %506, %513 : vector<8x32xi1>, vector<8x32xf32>
    %cst_203 = arith.constant dense<0.000000e+00> : vector<8x32xf32>
    %515 = tpu.matmul %514, %1, %cst_203 {dimension_numbers = #tpu.dot_dimension_numbers<[1], [0], [0], [1], [0, 0, 1, 1], [], []>} : vector<8x32xf32>, vector<32x32xf32>, vector<8x32xf32> -> vector<8x32xf32>
    %516 = arith.addf %515, %9 : vector<8x32xf32>
    %cst_204 = arith.constant 0.000000e+00 : f32
    %517 = vector.broadcast %cst_204 : f32 to vector<8x32xf32>
    %518 = arith.cmpf ogt, %516, %517 : vector<8x32xf32>
    %cst_205 = arith.constant 0.000000e+00 : f32
    %519 = vector.broadcast %cst_205 : f32 to vector<8x32xf32>
    %520 = arith.minimumf %516, %519 : vector<8x32xf32>
    %521 = math.exp %520 : vector<8x32xf32>
    %cst_206 = arith.constant 1.000000e+00 : f32
    %522 = vector.broadcast %cst_206 : f32 to vector<8x32xf32>
    %523 = arith.subf %521, %522 : vector<8x32xf32>
    %524 = arith.select %518, %516, %523 : vector<8x32xi1>, vector<8x32xf32>
    %cst_207 = arith.constant dense<0.000000e+00> : vector<8x8xf32>
    %525 = tpu.matmul %524, %39, %cst_207 {dimension_numbers = #tpu.dot_dimension_numbers<[1], [0], [0], [1], [0, 0, 1, 1], [], []>} : vector<8x32xf32>, vector<32x8xf32>, vector<8x8xf32> -> vector<8x8xf32>
    %526 = arith.addf %504, %525 : vector<8x8xf32>
    %527 = arith.addf %526, %43 : vector<8x8xf32>
    %cst_208 = arith.constant dense<0.000000e+00> : vector<8x16xf32>
    %528 = tpu.matmul %527, %3, %cst_208 {dimension_numbers = #tpu.dot_dimension_numbers<[1], [0], [0], [1], [0, 0, 1, 1], [], []>} : vector<8x8xf32>, vector<8x16xf32>, vector<8x16xf32> -> vector<8x16xf32>
    %529 = arith.addf %528, %13 : vector<8x16xf32>
    %c0_209 = arith.constant 0 : index
    %c0_210 = arith.constant 0 : index
    %530 = vector.load %arg2[%c0_209, %c0_210] : memref<8x16xf32, #tpu.memory_space<vmem>>, vector<8x16xf32>
    tpu.vector_store %arg2[%c0_209, %c0_210], %529 {strides = array<i32>} : memref<8x16xf32, #tpu.memory_space<vmem>>, vector<8x16xf32>,
    return
  }
}

</mosaic_0001>

<bundles_post_ra>
// kernel: tpu_custom_call.1
= control target key start
LH: loop header
LB: loop body
LE: loop exit
PB: predicated region body
PF: predicated region fallthrough
CT: control target
= control target key end

     0   :  { %7 = vsyncpa [#allocation3], 0  ;;  %s6999_s0 = inlined_call_operand.hbm [shape: f32[8,8], index: 0, kind: input, shape index: {}]   ;;  %s7000_s1 = inlined_call_operand.hbm [shape: f32[112,128], index: 1, kind: input, shape index: {}]   ;;  %s7001_s2 = inlined_call_operand.hbm [shape: f32[8,16], index: 2, kind: output, shape index: {}]  }
   0x1   :  { %8 = vsyncpa [#allocation6], 0 }
   0x2   :  { %9 = vsyncpa [#allocation4], 0  ;;  %s6200_s9 = smov [#allocation2]   ;;  %s6201_s11 = smov [#allocation5]  }
   0x3   :  { %s16_s10 = sshll.u32 %s6200_s9, 4  ;;  %s25_s12 = sshll.u32 %s6201_s11, 4  ;;  %s17_s10 = int_to_ptr.vmem [resolvable:$true] %s16_s10  ;;  %s26_s12 = int_to_ptr.vmem [resolvable:$true] %s25_s12 }
   0x4   :  { %s6142_s13 = scalar_lea.vmem %s17_s10, 128  ;;  %p6147_p1 = scmp.lt.s32.totalorder %s17_s10, %s17_s10 }
   0x5   :  { %p6143_p0 = scmp.ne.s32.totalorder %s17_s10, %s6142_s13  ;;  %p6148_p2 = scmp.lt.s32.totalorder %s6142_s13, %s6142_s13 }
   0x7   :  { %p6149_p3 = por %p6148_p2, %p6147_p1 }
   0x9   :  { %p6150_p4 = pnand %p6149_p3, %p6143_p0 }
   0xb   :  { %6153 = shalt.err (!%p6150_p4)
}
   0xc   :  { %19 = dma.hbm_to_vmem [thread:$0]  %s6999_s0, 128, %s17_s10, [#allocation3]  }
   0xd   :  { %s6162_s16 = scalar_lea.vmem %s26_s12, 1792  ;;  %p6167_p6 = scmp.lt.s32.totalorder %s26_s12, %s26_s12 }
   0xe   :  { %p6163_p5 = scmp.ne.s32.totalorder %s26_s12, %s6162_s16  ;;  %p6168_p7 = scmp.lt.s32.totalorder %s6162_s16, %s6162_s16 }
  0x10   :  { %p6169_p8 = por %p6168_p7, %p6167_p6 }
  0x12   :  { %p6170_p9 = pnand %p6169_p8, %p6163_p5 }
  0x14   :  { %6173 = shalt.err (!%p6170_p9)
}
  0x15   :  { %s6202_s17 = smov 128   ;;  %s6203_s18 = smov 8  }
  0x16   :  { %31 = dma.hbm_to_vmem [thread:$0]  %s7000_s1, 1792, %s26_s12, [#allocation6], %s6202_s17, %s6202_s17, %s6203_s18  }
  0x17   :  { %6194 = dma.done.wait [#allocation3], 128  }
  0x18   :  { %6195 = vsyncadd [#allocation3], 4294967168 }
  0x19   :  { %6196 = dma.done.wait [#allocation6], 1792  }
  0x1a   :  { %6197 = vsyncadd [#allocation6], 4294965504  ;;  %v6204_v0 = vmov 0.0   ;;  %vm6205_vm0 = vmmov 0   ;;  %vm110_vm1 = vcmask 64512   ;;  %v6234_v1 = vld [vmem:[#allocation5] sm:$0xff]  ;;  %v69_v33 = vlaneseq }
  0x1b   :  { %5459 = vmatprep.subr.mxu0 %v6204_v0  ;;  %5461 = vmatprep.mubr.msk.f32.mxu0 %vm6205_vm0, %v6204_v0  ;;  %v6236_v2 = vld [vmem:[#allocation2] sm:$0xff]  ;;  %v6244_v3 = vld [vmem:[#allocation5 + $0x28] sm:$0xff]  ;;  %v6246_v4 = vld [vmem:[#allocation5 + $0x20] sm:$0xff]  ;;  %vm190_vm2 = vcmask 261120   ;;  %s6206_s0 = smov [#allocation7]  }
  0x1c   :  { %5464 = vmatprep.subr.mxu1 %v6204_v0  ;;  %5472 = vmatprep.mubr.msk.f32.mxu1 %vm6205_vm0, %v6204_v0  ;;  %v6250_v5 = vld [vmem:[#allocation5 + $0x18] sm:$0xff]  ;;  %v6254_v6 = vld [vmem:[#allocation5 + $0x10] sm:$0xff]  ;;  %v6260_v7 = vld [vmem:[#allocation5 + $0x8] ss:$0 sm:$0xff]  ;;  %v70_v34 = vshrl.u32 %v69_v33, 7  ;;  %s5086_s1 = sshll.u32 %s6206_s0, 4  ;;  %s5087_s1 = int_to_ptr.vmem [resolvable:$true] %s5086_s1 }
  0x1d   :  { %5460 = vmatpush3.msra.mxu0 %v6234_v1  ;;  %5465 = vmatpush3.msra.mxu1 %v6244_v3  ;;  %v6268_v16 = vld [vmem:[#allocation5 + $0x50] sm:$0xff]  ;;  %v6273_v18 = vld [vmem:[#allocation5 + $0x48] sm:$0xff]  ;;  %v6280_v20 = vld [vmem:[#allocation5 + $0x40] sm:$0xff]  ;;  %s6174_s21 = scalar_lea.vmem %s5087_s1, 128  ;;  %p6179_p11 = scmp.lt.s32.totalorder %s5087_s1, %s5087_s1 }
  0x1e   :  { %5462 = vmatmul.mubr.msk.f32.vlgmr.msra.gmra.mxu0 %vm110_vm1, %v6236_v2  ;;  %5475 = vmatprep.subr.mxu0 %v6204_v0  ;;  %v6271_v17 = vmul.f32 0.04761905, %v6268_v16  ;;  %v6277_v19 = vmul.f32 0.04761905, %v6273_v18  ;;  %v6284_v21 = vmul.f32 0.04761905, %v6280_v20  ;;  %p6175_p10 = scmp.ne.s32.totalorder %s5087_s1, %s6174_s21  ;;  %p6180_p12 = scmp.lt.s32.totalorder %s6174_s21, %s6174_s21 }
  0x1f   :  { %5483 = vmatprep.mubr.msk.f32.mxu0 %vm6205_vm0, %v6204_v0  ;;  %5466 = vmatprep.subr.mxu1 %v6204_v0  ;;  %v6287_v22 = vld [vmem:[#allocation5 + $0x38] sm:$0xff]  ;;  %v6296_v24 = vld [vmem:[#allocation5 + $0x30] ss:$0 sm:$0xff]  ;;  %v6313_v37 = vsub.s32 0, %v70_v34 }
  0x20   :  { %5467 = vmatpush3.msra.mxu1 %v6246_v4  ;;  %5476 = vmatpush3.msra.mxu0 %v6271_v17  ;;  %v6291_v23 = vmul.f32 0.04761905, %v6287_v22  ;;  %v6310_v35 = vld [vmem:[#allocation5 + $0x58] sm:$0x1]  ;;  %p6181_p13 = por %p6180_p12, %p6179_p11 }
  0x21   :  { %5468 = vmatprep.subr.mxu1 %v6204_v0  ;;  %5477 = vmatprep.subr.mxu0 %v6204_v0  ;;  %v68_v36 = vmul.f32 0.04761905, %v6310_v35 }
  0x22   :  { %5469 = vmatpush3.msra.mxu1 %v6250_v5  ;;  %5478 = vmatpush3.msra.mxu0 %v6277_v19  ;;  %p6182_p0 = pnand %p6181_p13, %p6175_p10 }
  0x23   :  { %5470 = vmatprep.subr.mxu1 %v6204_v0  ;;  %5479 = vmatprep.subr.mxu0 %v6204_v0  ;;  %v6316_v38 = vrot.slane %v68_v36, %v6313_v37 }
  0x24   :  { %5471 = vmatpush3.msra.mxu1 %v6254_v6  ;;  %5480 = vmatpush3.msra.mxu0 %v6284_v21 }
  0x25   :  { %5486 = vmatprep.subr.mxu1 %v6204_v0  ;;  %5481 = vmatprep.subr.mxu0 %v6204_v0 }
  0x26   :  { %5482 = vmatpush3.msra.mxu0 %v6291_v23 }
  0x27   :  { %5491 = vmatprep.subr.mxu0 %v6204_v0 }
  0xde   :  { %v180_v8 = vpop.f32.mrf.mxu0 }
  0xdf   :  { %v181_v9 = vadd.f32 %v6260_v7, %v180_v8 }
  0xe0   :  { %v5463_v10 = vpop.f32.mrf.mxu0 }
  0xe1   :  { %v185_v11 = vmin.f32 %v181_v9, 0.0  ;;  %vm184_vm3 = vcmp.gt.f32.partialorder %v181_v9, 0.0 }
  0xe3   :  { %v186_v12 = vmul.f32 1.442695, %v185_v11 }
  0xe5   :  { %6038 = vpow2.f32 %v186_v12 }
  0xf2   :  { %v6039_v13 = vpop.eup %6038 }
  0xf3   :  { %v5100_v14 = vadd.f32 -1.0, %v6039_v13 }
  0xf5   :  { %v189_v15 = vsel %vm184_vm3, %v181_v9, %v5100_v14 }
  0xf6   :  { %5473 = vmatmul.mubr.msk.f32.vlgmr.msra.gmra.mxu1 %vm190_vm2, %v189_v15 }
  0xf7   :  { %5487 = vmatpush3.msra.mxu1 %v6234_v1  ;;  %5488 = vmatprep.mubr.msk.f32.mxu1 %vm6205_vm0, %v6204_v0 }
  0xf8   :  { %5502 = vmatprep.subr.mxu1 %v6204_v0 }
 0x1b6   :  { %v260_v25 = vpop.f32.mrf.mxu1 }
 0x1b7   :  { %v261_v26 = vadd.f32 %v6296_v24, %v260_v25 }
 0x1b8   :  { %v5474_v27 = vpop.f32.mrf.mxu1 }
 0x1b9   :  { %v265_v28 = vmin.f32 %v261_v26, 0.0  ;;  %vm264_vm4 = vcmp.gt.f32.partialorder %v261_v26, 0.0 }
 0x1bb   :  { %v266_v29 = vmul.f32 1.442695, %v265_v28 }
 0x1bd   :  { %6040 = vpow2.f32 %v266_v29 }
 0x1ca   :  { %v6041_v30 = vpop.eup %6040 }
 0x1cb   :  { %v5102_v31 = vadd.f32 -1.0, %v6041_v30 }
 0x1cd   :  { %v269_v32 = vsel %vm264_vm4, %v261_v26, %v5102_v31 }
 0x1ce   :  { %5484 = vmatmul.mubr.msk.f32.vlgmr.msra.gmra.mxu0 %vm190_vm2, %v269_v32 }
 0x1cf   :  { %5492 = vmatpush3.msra.mxu0 %v6244_v3  ;;  %5499 = vmatprep.mubr.msk.f32.mxu0 %vm6205_vm0, %v6204_v0 }
 0x1d0   :  { %5493 = vmatprep.subr.mxu0 %v6204_v0 }
 0x1d1   :  { %5494 = vmatpush3.msra.mxu0 %v6246_v4 }
 0x1d2   :  { %5495 = vmatprep.subr.mxu0 %v6204_v0 }
 0x1d3   :  { %5496 = vmatpush3.msra.mxu0 %v6250_v5 }
 0x1d4   :  { %5497 = vmatprep.subr.mxu0 %v6204_v0 }
 0x1d5   :  { %5498 = vmatpush3.msra.mxu0 %v6254_v6 }
 0x1d6   :  { %5513 = vmatprep.subr.mxu0 %v6204_v0 }
 0x28e   :  { %v339_v39 = vpop.f32.mrf.mxu0 }
 0x28f   :  { %v343_v40 = vadd.f32 %v339_v39, %v6236_v2 }
 0x290   :  { %v5485_v41 = vpop.f32.mrf.mxu0 }
 0x291   :  { %v344_v42 = vadd.f32 %v343_v40, %v6316_v38 }
 0x293   :  { %5489 = vmatmul.mubr.msk.f32.vlgmr.msra.gmra.mxu1 %vm110_vm1, %v344_v42 }
 0x294   :  { %5503 = vmatpush3.msra.mxu1 %v6271_v17  ;;  %5510 = vmatprep.mubr.msk.f32.mxu1 %vm6205_vm0, %v6204_v0 }
 0x295   :  { %5504 = vmatprep.subr.mxu1 %v6204_v0 }
 0x296   :  { %5505 = vmatpush3.msra.mxu1 %v6277_v19 }
 0x297   :  { %5506 = vmatprep.subr.mxu1 %v6204_v0 }
 0x298   :  { %5507 = vmatpush3.msra.mxu1 %v6284_v21 }
 0x299   :  { %5508 = vmatprep.subr.mxu1 %v6204_v0 }
 0x29a   :  { %5509 = vmatpush3.msra.mxu1 %v6291_v23 }
 0x29b   :  { %5518 = vmatprep.subr.mxu1 %v6204_v0 }
 0x353   :  { %v414_v43 = vpop.f32.mrf.mxu1 }
 0x354   :  { %v415_v44 = vadd.f32 %v6260_v7, %v414_v43 }
 0x355   :  { %v5490_v45 = vpop.f32.mrf.mxu1 }
 0x356   :  { %v419_v46 = vmin.f32 %v415_v44, 0.0  ;;  %vm418_vm5 = vcmp.gt.f32.partialorder %v415_v44, 0.0 }
 0x358   :  { %v420_v47 = vmul.f32 1.442695, %v419_v46 }
 0x35a   :  { %6042 = vpow2.f32 %v420_v47 }
 0x367   :  { %v6043_v48 = vpop.eup %6042 }
 0x368   :  { %v5105_v49 = vadd.f32 -1.0, %v6043_v48 }
 0x36a   :  { %v423_v50 = vsel %vm418_vm5, %v415_v44, %v5105_v49 }
 0x36b   :  { %5500 = vmatmul.mubr.msk.f32.vlgmr.msra.gmra.mxu0 %vm190_vm2, %v423_v50 }
 0x36c   :  { %5514 = vmatpush3.msra.mxu0 %v6234_v1  ;;  %5515 = vmatprep.mubr.msk.f32.mxu0 %vm6205_vm0, %v6204_v0 }
 0x36d   :  { %5529 = vmatprep.subr.mxu0 %v6204_v0 }
 0x42b   :  { %v493_v51 = vpop.f32.mrf.mxu0 }
 0x42c   :  { %v494_v52 = vadd.f32 %v6296_v24, %v493_v51 }
 0x42d   :  { %v5501_v53 = vpop.f32.mrf.mxu0 }
 0x42e   :  { %v498_v54 = vmin.f32 %v494_v52, 0.0  ;;  %vm497_vm6 = vcmp.gt.f32.partialorder %v494_v52, 0.0 }
 0x430   :  { %v499_v55 = vmul.f32 1.442695, %v498_v54 }
 0x432   :  { %6044 = vpow2.f32 %v499_v55 }
 0x43f   :  { %v6045_v56 = vpop.eup %6044 }
 0x440   :  { %v5107_v57 = vadd.f32 -1.0, %v6045_v56 }
 0x442   :  { %v502_v58 = vsel %vm497_vm6, %v494_v52, %v5107_v57 }
 0x443   :  { %5511 = vmatmul.mubr.msk.f32.vlgmr.msra.gmra.mxu1 %vm190_vm2, %v502_v58 }
 0x444   :  { %5519 = vmatpush3.msra.mxu1 %v6244_v3  ;;  %5526 = vmatprep.mubr.msk.f32.mxu1 %vm6205_vm0, %v6204_v0 }
 0x445   :  { %5520 = vmatprep.subr.mxu1 %v6204_v0 }
 0x446   :  { %5521 = vmatpush3.msra.mxu1 %v6246_v4 }
 0x447   :  { %5522 = vmatprep.subr.mxu1 %v6204_v0 }
 0x448   :  { %5523 = vmatpush3.msra.mxu1 %v6250_v5 }
 0x449   :  { %5524 = vmatprep.subr.mxu1 %v6204_v0 }
 0x44a   :  { %5525 = vmatpush3.msra.mxu1 %v6254_v6 }
 0x44b   :  { %5540 = vmatprep.subr.mxu1 %v6204_v0 }
 0x503   :  { %v572_v59 = vpop.f32.mrf.mxu1 }
 0x504   :  { %v576_v60 = vadd.f32 %v572_v59, %v344_v42 }
 0x505   :  { %v5512_v61 = vpop.f32.mrf.mxu1 }
 0x506   :  { %v577_v62 = vadd.f32 %v576_v60, %v6316_v38 }
 0x508   :  { %5516 = vmatmul.mubr.msk.f32.vlgmr.msra.gmra.mxu0 %vm110_vm1, %v577_v62 }
 0x509   :  { %5530 = vmatpush3.msra.mxu0 %v6271_v17  ;;  %5537 = vmatprep.mubr.msk.f32.mxu0 %vm6205_vm0, %v6204_v0 }
 0x50a   :  { %5531 = vmatprep.subr.mxu0 %v6204_v0 }
 0x50b   :  { %5532 = vmatpush3.msra.mxu0 %v6277_v19 }
 0x50c   :  { %5533 = vmatprep.subr.mxu0 %v6204_v0 }
 0x50d   :  { %5534 = vmatpush3.msra.mxu0 %v6284_v21 }
 0x50e   :  { %5535 = vmatprep.subr.mxu0 %v6204_v0 }
 0x50f   :  { %5536 = vmatpush3.msra.mxu0 %v6291_v23 }
 0x510   :  { %5545 = vmatprep.subr.mxu0 %v6204_v0 }
 0x5c8   :  { %v647_v63 = vpop.f32.mrf.mxu0 }
 0x5c9   :  { %v648_v2 = vadd.f32 %v6260_v7, %v647_v63 }
 0x5ca   :  { %v5517_v8 = vpop.f32.mrf.mxu0 }
 0x5cb   :  { %v652_v9 = vmin.f32 %v648_v2, 0.0  ;;  %vm651_vm7 = vcmp.gt.f32.partialorder %v648_v2, 0.0 }
 0x5cd   :  { %v653_v10 = vmul.f32 1.442695, %v652_v9 }
 0x5cf   :  { %6046 = vpow2.f32 %v653_v10 }
 0x5dc   :  { %v6047_v11 = vpop.eup %6046 }
 0x5dd   :  { %v5110_v12 = vadd.f32 -1.0, %v6047_v11 }
 0x5df   :  { %v656_v13 = vsel %vm651_vm7, %v648_v2, %v5110_v12 }
 0x5e0   :  { %5527 = vmatmul.mubr.msk.f32.vlgmr.msra.gmra.mxu1 %vm190_vm2, %v656_v13 }
 0x5e1   :  { %5541 = vmatpush3.msra.mxu1 %v6234_v1  ;;  %5542 = vmatprep.mubr.msk.f32.mxu1 %vm6205_vm0, %v6204_v0 }
 0x5e2   :  { %5556 = vmatprep.subr.mxu1 %v6204_v0 }
 0x6a0   :  { %v726_v14 = vpop.f32.mrf.mxu1 }
 0x6a1   :  { %v727_v15 = vadd.f32 %v6296_v24, %v726_v14 }
 0x6a2   :  { %v5528_v25 = vpop.f32.mrf.mxu1 }
 0x6a3   :  { %v731_v26 = vmin.f32 %v727_v15, 0.0  ;;  %vm730_vm8 = vcmp.gt.f32.partialorder %v727_v15, 0.0 }
 0x6a5   :  { %v732_v27 = vmul.f32 1.442695, %v731_v26 }
 0x6a7   :  { %6048 = vpow2.f32 %v732_v27 }
 0x6b4   :  { %v6049_v28 = vpop.eup %6048 }
 0x6b5   :  { %v5112_v29 = vadd.f32 -1.0, %v6049_v28 }
 0x6b7   :  { %v735_v30 = vsel %vm730_vm8, %v727_v15, %v5112_v29 }
 0x6b8   :  { %5538 = vmatmul.mubr.msk.f32.vlgmr.msra.gmra.mxu0 %vm190_vm2, %v735_v30 }
 0x6b9   :  { %5546 = vmatpush3.msra.mxu0 %v6244_v3  ;;  %5553 = vmatprep.mubr.msk.f32.mxu0 %vm6205_vm0, %v6204_v0 }
 0x6ba   :  { %5547 = vmatprep.subr.mxu0 %v6204_v0 }
 0x6bb   :  { %5548 = vmatpush3.msra.mxu0 %v6246_v4 }
 0x6bc   :  { %5549 = vmatprep.subr.mxu0 %v6204_v0 }
 0x6bd   :  { %5550 = vmatpush3.msra.mxu0 %v6250_v5 }
 0x6be   :  { %5551 = vmatprep.subr.mxu0 %v6204_v0 }
 0x6bf   :  { %5552 = vmatpush3.msra.mxu0 %v6254_v6 }
 0x6c0   :  { %5567 = vmatprep.subr.mxu0 %v6204_v0 }
 0x778   :  { %v805_v31 = vpop.f32.mrf.mxu0 }
 0x779   :  { %v809_v32 = vadd.f32 %v805_v31, %v577_v62 }
 0x77a   :  { %v5539_v33 = vpop.f32.mrf.mxu0 }
 0x77b   :  { %v810_v34 = vadd.f32 %v809_v32, %v6316_v38 }
 0x77d   :  { %5543 = vmatmul.mubr.msk.f32.vlgmr.msra.gmra.mxu1 %vm110_vm1, %v810_v34 }
 0x77e   :  { %5557 = vmatpush3.msra.mxu1 %v6271_v17  ;;  %5564 = vmatprep.mubr.msk.f32.mxu1 %vm6205_vm0, %v6204_v0 }
 0x77f   :  { %5558 = vmatprep.subr.mxu1 %v6204_v0 }
 0x780   :  { %5559 = vmatpush3.msra.mxu1 %v6277_v19 }
 0x781   :  { %5560 = vmatprep.subr.mxu1 %v6204_v0 }
 0x782   :  { %5561 = vmatpush3.msra.mxu1 %v6284_v21 }
 0x783   :  { %5562 = vmatprep.subr.mxu1 %v6204_v0 }
 0x784   :  { %5563 = vmatpush3.msra.mxu1 %v6291_v23 }
 0x785   :  { %5572 = vmatprep.subr.mxu1 %v6204_v0 }
 0x83d   :  { %v880_v36 = vpop.f32.mrf.mxu1 }
 0x83e   :  { %v881_v39 = vadd.f32 %v6260_v7, %v880_v36 }
 0x83f   :  { %v5544_v40 = vpop.f32.mrf.mxu1 }
 0x840   :  { %v885_v41 = vmin.f32 %v881_v39, 0.0  ;;  %vm884_vm9 = vcmp.gt.f32.partialorder %v881_v39, 0.0 }
 0x842   :  { %v886_v42 = vmul.f32 1.442695, %v885_v41 }
 0x844   :  { %6050 = vpow2.f32 %v886_v42 }
 0x851   :  { %v6051_v43 = vpop.eup %6050 }
 0x852   :  { %v5115_v44 = vadd.f32 -1.0, %v6051_v43 }
 0x854   :  { %v889_v45 = vsel %vm884_vm9, %v881_v39, %v5115_v44 }
 0x855   :  { %5554 = vmatmul.mubr.msk.f32.vlgmr.msra.gmra.mxu0 %vm190_vm2, %v889_v45 }
 0x856   :  { %5568 = vmatpush3.msra.mxu0 %v6234_v1  ;;  %5569 = vmatprep.mubr.msk.f32.mxu0 %vm6205_vm0, %v6204_v0 }
 0x857   :  { %5583 = vmatprep.subr.mxu0 %v6204_v0 }
 0x915   :  { %v959_v46 = vpop.f32.mrf.mxu0 }
 0x916   :  { %v960_v47 = vadd.f32 %v6296_v24, %v959_v46 }
 0x917   :  { %v5555_v48 = vpop.f32.mrf.mxu0 }
 0x918   :  { %v964_v49 = vmin.f32 %v960_v47, 0.0  ;;  %vm963_vm10 = vcmp.gt.f32.partialorder %v960_v47, 0.0 }
 0x91a   :  { %v965_v50 = vmul.f32 1.442695, %v964_v49 }
 0x91c   :  { %6052 = vpow2.f32 %v965_v50 }
 0x929   :  { %v6053_v51 = vpop.eup %6052 }
 0x92a   :  { %v5117_v52 = vadd.f32 -1.0, %v6053_v51 }
 0x92c   :  { %v968_v53 = vsel %vm963_vm10, %v960_v47, %v5117_v52 }
 0x92d   :  { %5565 = vmatmul.mubr.msk.f32.vlgmr.msra.gmra.mxu1 %vm190_vm2, %v968_v53 }
 0x92e   :  { %5573 = vmatpush3.msra.mxu1 %v6244_v3  ;;  %5580 = vmatprep.mubr.msk.f32.mxu1 %vm6205_vm0, %v6204_v0 }
 0x92f   :  { %5574 = vmatprep.subr.mxu1 %v6204_v0 }
 0x930   :  { %5575 = vmatpush3.msra.mxu1 %v6246_v4 }
 0x931   :  { %5576 = vmatprep.subr.mxu1 %v6204_v0 }
 0x932   :  { %5577 = vmatpush3.msra.mxu1 %v6250_v5 }
 0x933   :  { %5578 = vmatprep.subr.mxu1 %v6204_v0 }
 0x934   :  { %5579 = vmatpush3.msra.mxu1 %v6254_v6 }
 0x935   :  { %5594 = vmatprep.subr.mxu1 %v6204_v0 }
 0x9ed   :  { %v1038_v54 = vpop.f32.mrf.mxu1 }
 0x9ee   :  { %v1042_v55 = vadd.f32 %v1038_v54, %v810_v34 }
 0x9ef   :  { %v5566_v56 = vpop.f32.mrf.mxu1 }
 0x9f0   :  { %v1043_v57 = vadd.f32 %v1042_v55, %v6316_v38 }
 0x9f2   :  { %5570 = vmatmul.mubr.msk.f32.vlgmr.msra.gmra.mxu0 %vm110_vm1, %v1043_v57 }
 0x9f3   :  { %5584 = vmatpush3.msra.mxu0 %v6271_v17  ;;  %5591 = vmatprep.mubr.msk.f32.mxu0 %vm6205_vm0, %v6204_v0 }
 0x9f4   :  { %5585 = vmatprep.subr.mxu0 %v6204_v0 }
 0x9f5   :  { %5586 = vmatpush3.msra.mxu0 %v6277_v19 }
 0x9f6   :  { %5587 = vmatprep.subr.mxu0 %v6204_v0 }
 0x9f7   :  { %5588 = vmatpush3.msra.mxu0 %v6284_v21 }
 0x9f8   :  { %5589 = vmatprep.subr.mxu0 %v6204_v0 }
 0x9f9   :  { %5590 = vmatpush3.msra.mxu0 %v6291_v23 }
 0x9fa   :  { %5599 = vmatprep.subr.mxu0 %v6204_v0 }
 0xab2   :  { %v1113_v58 = vpop.f32.mrf.mxu0 }
 0xab3   :  { %v1114_v59 = vadd.f32 %v6260_v7, %v1113_v58  ;;  %v6489_v58 = vmul.f32 0.047619056, %v6280_v20 }
 0xab4   :  { %v5571_v60 = vpop.f32.mrf.mxu0 }
 0xab5   :  { %v1118_v61 = vmin.f32 %v1114_v59, 0.0  ;;  %vm1117_vm11 = vcmp.gt.f32.partialorder %v1114_v59, 0.0 }
 0xab7   :  { %v1119_v62 = vmul.f32 1.442695, %v1118_v61 }
 0xab9   :  { %6054 = vpow2.f32 %v1119_v62 }
 0xac6   :  { %v6055_v63 = vpop.eup %6054 }
 0xac7   :  { %v5120_v2 = vadd.f32 -1.0, %v6055_v63 }
 0xac9   :  { %v1122_v8 = vsel %vm1117_vm11, %v1114_v59, %v5120_v2  ;;  %v6494_v59 = vmul.f32 0.047619056, %v6287_v22 }
 0xaca   :  { %5581 = vmatmul.mubr.msk.f32.vlgmr.msra.gmra.mxu1 %vm190_vm2, %v1122_v8 }
 0xacb   :  { %5595 = vmatpush3.msra.mxu1 %v6234_v1  ;;  %5596 = vmatprep.mubr.msk.f32.mxu1 %vm6205_vm0, %v6204_v0 }
 0xacc   :  { %5610 = vmatprep.subr.mxu1 %v6204_v0 }
 0xb8a   :  { %v1192_v9 = vpop.f32.mrf.mxu1 }
 0xb8b   :  { %v1193_v10 = vadd.f32 %v6296_v24, %v1192_v9 }
 0xb8c   :  { %v5582_v11 = vpop.f32.mrf.mxu1 }
 0xb8d   :  { %v1197_v12 = vmin.f32 %v1193_v10, 0.0  ;;  %vm1196_vm12 = vcmp.gt.f32.partialorder %v1193_v10, 0.0  ;;  %v77_v11 = vmul.f32 0.047619056, %v6310_v35 }
 0xb8f   :  { %v1198_v13 = vmul.f32 1.442695, %v1197_v12  ;;  %v6513_v12 = vrot.slane %v77_v11, %v6313_v37 }
 0xb91   :  { %6056 = vpow2.f32 %v1198_v13 }
 0xb9e   :  { %v6057_v14 = vpop.eup %6056 }
 0xb9f   :  { %v5122_v15 = vadd.f32 -1.0, %v6057_v14 }
 0xba1   :  { %v1201_v25 = vsel %vm1196_vm12, %v1193_v10, %v5122_v15 }
 0xba2   :  { %5592 = vmatmul.mubr.msk.f32.vlgmr.msra.gmra.mxu0 %vm190_vm2, %v1201_v25 }
 0xba3   :  { %5600 = vmatpush3.msra.mxu0 %v6244_v3  ;;  %5607 = vmatprep.mubr.msk.f32.mxu0 %vm6205_vm0, %v6204_v0 }
 0xba4   :  { %5601 = vmatprep.subr.mxu0 %v6204_v0 }
 0xba5   :  { %5602 = vmatpush3.msra.mxu0 %v6246_v4 }
 0xba6   :  { %5603 = vmatprep.subr.mxu0 %v6204_v0 }
 0xba7   :  { %5604 = vmatpush3.msra.mxu0 %v6250_v5 }
 0xba8   :  { %5605 = vmatprep.subr.mxu0 %v6204_v0 }
 0xba9   :  { %5606 = vmatpush3.msra.mxu0 %v6254_v6 }
 0xbaa   :  { %5621 = vmatprep.subr.mxu0 %v6204_v0 }
 0xc62   :  { %v1271_v26 = vpop.f32.mrf.mxu0 }
 0xc63   :  { %v1275_v27 = vadd.f32 %v1271_v26, %v1043_v57  ;;  %v6484_v57 = vmul.f32 0.047619056, %v6273_v18 }
 0xc64   :  { %v5593_v28 = vpop.f32.mrf.mxu0 }
 0xc65   :  { %v1276_v29 = vadd.f32 %v1275_v27, %v6316_v38 }
 0xc67   :  { %5597 = vmatmul.mubr.msk.f32.vlgmr.msra.gmra.mxu1 %vm110_vm1, %v1276_v29 }
 0xc68   :  { %5611 = vmatpush3.msra.mxu1 %v6271_v17  ;;  %5618 = vmatprep.mubr.msk.f32.mxu1 %vm6205_vm0, %v6204_v0 }
 0xc69   :  { %5612 = vmatprep.subr.mxu1 %v6204_v0 }
 0xc6a   :  { %5613 = vmatpush3.msra.mxu1 %v6277_v19 }
 0xc6b   :  { %5614 = vmatprep.subr.mxu1 %v6204_v0 }
 0xc6c   :  { %5615 = vmatpush3.msra.mxu1 %v6284_v21 }
 0xc6d   :  { %5616 = vmatprep.subr.mxu1 %v6204_v0 }
 0xc6e   :  { %5617 = vmatpush3.msra.mxu1 %v6291_v23 }
 0xc6f   :  { %5626 = vmatprep.subr.mxu1 %v6204_v0 }
 0xd27   :  { %v1346_v30 = vpop.f32.mrf.mxu1 }
 0xd28   :  { %v1347_v17 = vadd.f32 %v6260_v7, %v1346_v30 }
 0xd29   :  { %v5598_v31 = vpop.f32.mrf.mxu1 }
 0xd2a   :  { %v1351_v32 = vmin.f32 %v1347_v17, 0.0  ;;  %vm1350_vm13 = vcmp.gt.f32.partialorder %v1347_v17, 0.0 }
 0xd2c   :  { %v1352_v33 = vmul.f32 1.442695, %v1351_v32 }
 0xd2e   :  { %6058 = vpow2.f32 %v1352_v33 }
 0xd3b   :  { %v6059_v34 = vpop.eup %6058 }
 0xd3c   :  { %v5125_v36 = vadd.f32 -1.0, %v6059_v34 }
 0xd3e   :  { %v1355_v19 = vsel %vm1350_vm13, %v1347_v17, %v5125_v36 }
 0xd3f   :  { %5608 = vmatmul.mubr.msk.f32.vlgmr.msra.gmra.mxu0 %vm190_vm2, %v1355_v19 }
 0xd40   :  { %5622 = vmatpush3.msra.mxu0 %v6234_v1  ;;  %5623 = vmatprep.mubr.msk.f32.mxu0 %vm6205_vm0, %v6204_v0 }
 0xd41   :  { %5637 = vmatprep.subr.mxu0 %v6204_v0 }
 0xdff   :  { %v1425_v21 = vpop.f32.mrf.mxu0 }
 0xe00   :  { %v1426_v23 = vadd.f32 %v6296_v24, %v1425_v21 }
 0xe01   :  { %v5609_v39 = vpop.f32.mrf.mxu0 }
 0xe02   :  { %v1430_v40 = vmin.f32 %v1426_v23, 0.0  ;;  %vm1429_vm14 = vcmp.gt.f32.partialorder %v1426_v23, 0.0 }
 0xe04   :  { %v1431_v41 = vmul.f32 1.442695, %v1430_v40 }
 0xe06   :  { %6060 = vpow2.f32 %v1431_v41 }
 0xe13   :  { %v6061_v42 = vpop.eup %6060 }
 0xe14   :  { %v5127_v43 = vadd.f32 -1.0, %v6061_v42 }
 0xe16   :  { %v1434_v44 = vsel %vm1429_vm14, %v1426_v23, %v5127_v43 }
 0xe17   :  { %5619 = vmatmul.mubr.msk.f32.vlgmr.msra.gmra.mxu1 %vm190_vm2, %v1434_v44 }
 0xe18   :  { %5627 = vmatpush3.msra.mxu1 %v6244_v3  ;;  %5634 = vmatprep.mubr.msk.f32.mxu1 %vm6205_vm0, %v6204_v0 }
 0xe19   :  { %5628 = vmatprep.subr.mxu1 %v6204_v0 }
 0xe1a   :  { %5629 = vmatpush3.msra.mxu1 %v6246_v4 }
 0xe1b   :  { %5630 = vmatprep.subr.mxu1 %v6204_v0 }
 0xe1c   :  { %5631 = vmatpush3.msra.mxu1 %v6250_v5 }
 0xe1d   :  { %5632 = vmatprep.subr.mxu1 %v6204_v0 }
 0xe1e   :  { %5633 = vmatpush3.msra.mxu1 %v6254_v6 }
 0xe1f   :  { %5648 = vmatprep.subr.mxu1 %v6204_v0 }
 0xed7   :  { %v1504_v45 = vpop.f32.mrf.mxu1 }
 0xed8   :  { %v1508_v46 = vadd.f32 %v1504_v45, %v1276_v29 }
 0xed9   :  { %v5620_v47 = vpop.f32.mrf.mxu1 }
 0xeda   :  { %v1509_v48 = vadd.f32 %v1508_v46, %v6316_v38  ;;  %v6480_v38 = vmul.f32 0.047619056, %v6268_v16 }
 0xedc   :  { %5624 = vmatmul.mubr.msk.f32.vlgmr.msra.gmra.mxu0 %vm110_vm1, %v1509_v48 }
 0xedd   :  { %5645 = vmatprep.mubr.msk.f32.mxu0 %vm6205_vm0, %v6204_v0  ;;  %5638 = vmatpush3.msra.mxu0 %v6480_v38 }
 0xede   :  { %5639 = vmatprep.subr.mxu0 %v6204_v0 }
 0xedf   :  { %5640 = vmatpush3.msra.mxu0 %v6484_v57 }
 0xee0   :  { %5641 = vmatprep.subr.mxu0 %v6204_v0 }
 0xee1   :  { %5642 = vmatpush3.msra.mxu0 %v6489_v58 }
 0xee2   :  { %5643 = vmatprep.subr.mxu0 %v6204_v0 }
 0xee3   :  { %5644 = vmatpush3.msra.mxu0 %v6494_v59 }
 0xee4   :  { %5653 = vmatprep.subr.mxu0 %v6204_v0 }
 0xf9c   :  { %v1579_v49 = vpop.f32.mrf.mxu0 }
 0xf9d   :  { %v1580_v50 = vadd.f32 %v6260_v7, %v1579_v49 }
 0xf9e   :  { %v5625_v51 = vpop.f32.mrf.mxu0 }
 0xf9f   :  { %v1584_v52 = vmin.f32 %v1580_v50, 0.0  ;;  %vm1583_vm15 = vcmp.gt.f32.partialorder %v1580_v50, 0.0 }
 0xfa1   :  { %v1585_v53 = vmul.f32 1.442695, %v1584_v52 }
 0xfa3   :  { %6062 = vpow2.f32 %v1585_v53 }
 0xfb0   :  { %v6063_v54 = vpop.eup %6062 }
 0xfb1   :  { %v5130_v55 = vadd.f32 -1.0, %v6063_v54 }
 0xfb3   :  { %v1588_v56 = vsel %vm1583_vm15, %v1580_v50, %v5130_v55 }
 0xfb4   :  { %5635 = vmatmul.mubr.msk.f32.vlgmr.msra.gmra.mxu1 %vm190_vm2, %v1588_v56 }
 0xfb5   :  { %5649 = vmatpush3.msra.mxu1 %v6234_v1  ;;  %5650 = vmatprep.mubr.msk.f32.mxu1 %vm6205_vm0, %v6204_v0 }
 0xfb6   :  { %5664 = vmatprep.subr.mxu1 %v6204_v0 }
0x1074   :  { %v1658_v60 = vpop.f32.mrf.mxu1 }
0x1075   :  { %v1659_v61 = vadd.f32 %v6296_v24, %v1658_v60 }
0x1076   :  { %v5636_v62 = vpop.f32.mrf.mxu1 }
0x1077   :  { %v1663_v63 = vmin.f32 %v1659_v61, 0.0  ;;  %vm1662_vm3 = vcmp.gt.f32.partialorder %v1659_v61, 0.0 }
0x1079   :  { %v1664_v2 = vmul.f32 1.442695, %v1663_v63 }
0x107b   :  { %6064 = vpow2.f32 %v1664_v2 }
0x1088   :  { %v6065_v8 = vpop.eup %6064 }
0x1089   :  { %v5132_v9 = vadd.f32 -1.0, %v6065_v8 }
0x108b   :  { %v1667_v10 = vsel %vm1662_vm3, %v1659_v61, %v5132_v9 }
0x108c   :  { %5646 = vmatmul.mubr.msk.f32.vlgmr.msra.gmra.mxu0 %vm190_vm2, %v1667_v10 }
0x108d   :  { %5654 = vmatpush3.msra.mxu0 %v6244_v3  ;;  %5661 = vmatprep.mubr.msk.f32.mxu0 %vm6205_vm0, %v6204_v0 }
0x108e   :  { %5655 = vmatprep.subr.mxu0 %v6204_v0 }
0x108f   :  { %5656 = vmatpush3.msra.mxu0 %v6246_v4 }
0x1090   :  { %5657 = vmatprep.subr.mxu0 %v6204_v0 }
0x1091   :  { %5658 = vmatpush3.msra.mxu0 %v6250_v5 }
0x1092   :  { %5659 = vmatprep.subr.mxu0 %v6204_v0 }
0x1093   :  { %5660 = vmatpush3.msra.mxu0 %v6254_v6 }
0x1094   :  { %5675 = vmatprep.subr.mxu0 %v6204_v0 }
0x114c   :  { %v1737_v13 = vpop.f32.mrf.mxu0 }
0x114d   :  { %v1741_v14 = vadd.f32 %v1737_v13, %v1509_v48 }
0x114e   :  { %v5647_v15 = vpop.f32.mrf.mxu0 }
0x114f   :  { %v1742_v25 = vadd.f32 %v1741_v14, %v6513_v12 }
0x1151   :  { %5651 = vmatmul.mubr.msk.f32.vlgmr.msra.gmra.mxu1 %vm110_vm1, %v1742_v25 }
0x1152   :  { %5665 = vmatpush3.msra.mxu1 %v6480_v38  ;;  %5672 = vmatprep.mubr.msk.f32.mxu1 %vm6205_vm0, %v6204_v0 }
0x1153   :  { %5666 = vmatprep.subr.mxu1 %v6204_v0 }
0x1154   :  { %5667 = vmatpush3.msra.mxu1 %v6484_v57 }
0x1155   :  { %5668 = vmatprep.subr.mxu1 %v6204_v0 }
0x1156   :  { %5669 = vmatpush3.msra.mxu1 %v6489_v58 }
0x1157   :  { %5670 = vmatprep.subr.mxu1 %v6204_v0 }
0x1158   :  { %5671 = vmatpush3.msra.mxu1 %v6494_v59 }
0x1159   :  { %5680 = vmatprep.subr.mxu1 %v6204_v0 }
0x1211   :  { %v1812_v26 = vpop.f32.mrf.mxu1 }
0x1212   :  { %v1813_v27 = vadd.f32 %v6260_v7, %v1812_v26 }
0x1213   :  { %v5652_v28 = vpop.f32.mrf.mxu1 }
0x1214   :  { %v1817_v29 = vmin.f32 %v1813_v27, 0.0  ;;  %vm1816_vm4 = vcmp.gt.f32.partialorder %v1813_v27, 0.0 }
0x1216   :  { %v1818_v30 = vmul.f32 1.442695, %v1817_v29 }
0x1218   :  { %6066 = vpow2.f32 %v1818_v30 }
0x1225   :  { %v6067_v17 = vpop.eup %6066 }
0x1226   :  { %v5135_v31 = vadd.f32 -1.0, %v6067_v17 }
0x1228   :  { %v1821_v32 = vsel %vm1816_vm4, %v1813_v27, %v5135_v31 }
0x1229   :  { %5662 = vmatmul.mubr.msk.f32.vlgmr.msra.gmra.mxu0 %vm190_vm2, %v1821_v32 }
0x122a   :  { %5676 = vmatpush3.msra.mxu0 %v6234_v1  ;;  %5677 = vmatprep.mubr.msk.f32.mxu0 %vm6205_vm0, %v6204_v0 }
0x122b   :  { %5691 = vmatprep.subr.mxu0 %v6204_v0 }
0x12e9   :  { %v1891_v33 = vpop.f32.mrf.mxu0 }
0x12ea   :  { %v1892_v34 = vadd.f32 %v6296_v24, %v1891_v33 }
0x12eb   :  { %v5663_v36 = vpop.f32.mrf.mxu0 }
0x12ec   :  { %v1896_v19 = vmin.f32 %v1892_v34, 0.0  ;;  %vm1895_vm5 = vcmp.gt.f32.partialorder %v1892_v34, 0.0 }
0x12ee   :  { %v1897_v21 = vmul.f32 1.442695, %v1896_v19 }
0x12f0   :  { %6068 = vpow2.f32 %v1897_v21 }
0x12fd   :  { %v6069_v23 = vpop.eup %6068 }
0x12fe   :  { %v5137_v39 = vadd.f32 -1.0, %v6069_v23 }
0x1300   :  { %v1900_v40 = vsel %vm1895_vm5, %v1892_v34, %v5137_v39  ;;  %v6637_v39 = vld [vmem:[#allocation5] sm:$0xff] }
0x1301   :  { %5673 = vmatmul.mubr.msk.f32.vlgmr.msra.gmra.mxu1 %vm190_vm2, %v1900_v40 }
0x1302   :  { %5681 = vmatpush3.msra.mxu1 %v6244_v3  ;;  %5688 = vmatprep.mubr.msk.f32.mxu1 %vm6205_vm0, %v6204_v0 }
0x1303   :  { %5682 = vmatprep.subr.mxu1 %v6204_v0 }
0x1304   :  { %5683 = vmatpush3.msra.mxu1 %v6246_v4 }
0x1305   :  { %5684 = vmatprep.subr.mxu1 %v6204_v0 }
0x1306   :  { %5685 = vmatpush3.msra.mxu1 %v6250_v5 }
0x1307   :  { %5686 = vmatprep.subr.mxu1 %v6204_v0 }
0x1308   :  { %5687 = vmatpush3.msra.mxu1 %v6254_v6 }
0x1309   :  { %5702 = vmatprep.subr.mxu1 %v6204_v0 }
0x13c1   :  { %v1970_v41 = vpop.f32.mrf.mxu1 }
0x13c2   :  { %v1974_v42 = vadd.f32 %v1970_v41, %v1742_v25  ;;  %v6595_v25 = vmul.f32 0.047619045, %v6280_v20 }
0x13c3   :  { %v5674_v43 = vpop.f32.mrf.mxu1 }
0x13c4   :  { %v1975_v44 = vadd.f32 %v1974_v42, %v6513_v12 }
0x13c6   :  { %5678 = vmatmul.mubr.msk.f32.vlgmr.msra.gmra.mxu0 %vm110_vm1, %v1975_v44 }
0x13c7   :  { %5692 = vmatpush3.msra.mxu0 %v6480_v38  ;;  %5699 = vmatprep.mubr.msk.f32.mxu0 %vm6205_vm0, %v6204_v0 }
0x13c8   :  { %5693 = vmatprep.subr.mxu0 %v6204_v0 }
0x13c9   :  { %5694 = vmatpush3.msra.mxu0 %v6484_v57 }
0x13ca   :  { %5695 = vmatprep.subr.mxu0 %v6204_v0 }
0x13cb   :  { %5696 = vmatpush3.msra.mxu0 %v6489_v58 }
0x13cc   :  { %5697 = vmatprep.subr.mxu0 %v6204_v0 }
0x13cd   :  { %5698 = vmatpush3.msra.mxu0 %v6494_v59 }
0x13ce   :  { %5707 = vmatprep.subr.mxu0 %v6204_v0 }
0x1486   :  { %v2045_v45 = vpop.f32.mrf.mxu0 }
0x1487   :  { %v2046_v46 = vadd.f32 %v6260_v7, %v2045_v45 }
0x1488   :  { %v5679_v47 = vpop.f32.mrf.mxu0 }
0x1489   :  { %v2050_v48 = vmin.f32 %v2046_v46, 0.0  ;;  %vm2049_vm6 = vcmp.gt.f32.partialorder %v2046_v46, 0.0 }
0x148b   :  { %v2051_v49 = vmul.f32 1.442695, %v2050_v48  ;;  %v6645_v48 = vld [vmem:[#allocation5 + $0x28] sm:$0xff] }
0x148d   :  { %6070 = vpow2.f32 %v2051_v49  ;;  %v6655_v49 = vld [vmem:[#allocation5 + $0x18] sm:$0xff] }
0x149a   :  { %v6071_v50 = vpop.eup %6070 }
0x149b   :  { %v5140_v51 = vadd.f32 -1.0, %v6071_v50  ;;  %v6659_v50 = vld [vmem:[#allocation5 + $0x10] sm:$0xff] }
0x149d   :  { %v2054_v52 = vsel %vm2049_vm6, %v2046_v46, %v5140_v51 }
0x149e   :  { %5689 = vmatmul.mubr.msk.f32.vlgmr.msra.gmra.mxu1 %vm190_vm2, %v2054_v52 }
0x149f   :  { %5703 = vmatpush3.msra.mxu1 %v6234_v1  ;;  %5704 = vmatprep.mubr.msk.f32.mxu1 %vm6205_vm0, %v6204_v0 }
0x14a0   :  { %5718 = vmatprep.subr.mxu1 %v6204_v0 }
0x155e   :  { %v2124_v53 = vpop.f32.mrf.mxu1 }
0x155f   :  { %v2125_v54 = vadd.f32 %v6296_v24, %v2124_v53 }
0x1560   :  { %v5690_v55 = vpop.f32.mrf.mxu1 }
0x1561   :  { %v2129_v56 = vmin.f32 %v2125_v54, 0.0  ;;  %vm2128_vm7 = vcmp.gt.f32.partialorder %v2125_v54, 0.0 }
0x1563   :  { %v2130_v38 = vmul.f32 1.442695, %v2129_v56 }
0x1565   :  { %6072 = vpow2.f32 %v2130_v38 }
0x1572   :  { %v6073_v57 = vpop.eup %6072 }
0x1573   :  { %v5142_v58 = vadd.f32 -1.0, %v6073_v57 }
0x1575   :  { %v2133_v59 = vsel %vm2128_vm7, %v2125_v54, %v5142_v58 }
0x1576   :  { %5700 = vmatmul.mubr.msk.f32.vlgmr.msra.gmra.mxu0 %vm190_vm2, %v2133_v59 }
0x1577   :  { %5708 = vmatpush3.msra.mxu0 %v6244_v3  ;;  %5715 = vmatprep.mubr.msk.f32.mxu0 %vm6205_vm0, %v6204_v0 }
0x1578   :  { %5709 = vmatprep.subr.mxu0 %v6204_v0 }
0x1579   :  { %5710 = vmatpush3.msra.mxu0 %v6246_v4 }
0x157a   :  { %5711 = vmatprep.subr.mxu0 %v6204_v0 }
0x157b   :  { %5712 = vmatpush3.msra.mxu0 %v6250_v5 }
0x157c   :  { %5713 = vmatprep.subr.mxu0 %v6204_v0 }
0x157d   :  { %5714 = vmatpush3.msra.mxu0 %v6254_v6 }
0x157e   :  { %5729 = vmatprep.subr.mxu0 %v6204_v0 }
0x1636   :  { %v2203_v60 = vpop.f32.mrf.mxu0 }
0x1637   :  { %v2207_v61 = vadd.f32 %v2203_v60, %v1975_v44 }
0x1638   :  { %v5701_v62 = vpop.f32.mrf.mxu0 }
0x1639   :  { %v2208_v63 = vadd.f32 %v2207_v61, %v6513_v12  ;;  %v6586_v12 = vmul.f32 0.047619045, %v6268_v16 }
0x163b   :  { %5705 = vmatmul.mubr.msk.f32.vlgmr.msra.gmra.mxu1 %vm110_vm1, %v2208_v63 }
0x163c   :  { %5726 = vmatprep.mubr.msk.f32.mxu1 %vm6205_vm0, %v6204_v0  ;;  %5719 = vmatpush3.msra.mxu1 %v6586_v12 }
0x163d   :  { %5720 = vmatprep.subr.mxu1 %v6204_v0 }
0x16fb   :  { %v2278_v2 = vpop.f32.mrf.mxu1 }
0x16fc   :  { %v2279_v8 = vadd.f32 %v6260_v7, %v2278_v2  ;;  %v6590_v7 = vmul.f32 0.047619045, %v6273_v18 }
0x16fd   :  { %v5706_v9 = vpop.f32.mrf.mxu1 }
0x16fe   :  { %v2283_v10 = vmin.f32 %v2279_v8, 0.0  ;;  %vm2282_vm8 = vcmp.gt.f32.partialorder %v2279_v8, 0.0  ;;  %5721 = vmatpush3.msra.mxu1 %v6590_v7 }
0x16ff   :  { %5722 = vmatprep.subr.mxu1 %v6204_v0 }
0x1700   :  { %v2284_v11 = vmul.f32 1.442695, %v2283_v10  ;;  %5723 = vmatpush3.msra.mxu1 %v6595_v25 }
0x1701   :  { %5724 = vmatprep.subr.mxu1 %v6204_v0 }
0x1702   :  { %6074 = vpow2.f32 %v2284_v11 }
0x170f   :  { %v6075_v13 = vpop.eup %6074 }
0x1710   :  { %v5145_v14 = vadd.f32 -1.0, %v6075_v13 }
0x1712   :  { %v2287_v15 = vsel %vm2282_vm8, %v2279_v8, %v5145_v14 }
0x1713   :  { %5716 = vmatmul.mubr.msk.f32.vlgmr.msra.gmra.mxu0 %vm190_vm2, %v2287_v15 }
0x1714   :  { %5730 = vmatpush3.msra.mxu0 %v6234_v1  ;;  %5731 = vmatprep.mubr.msk.f32.mxu0 %vm6205_vm0, %v6204_v0  ;;  %v6600_v1 = vmul.f32 0.047619045, %v6287_v22  ;;  %v86_v22 = vmul.f32 0.047619045, %v6310_v35 }
0x1715   :  { %5745 = vmatprep.subr.mxu0 %v6204_v0 }
0x1716   :  { %5725 = vmatpush3.msra.mxu1 %v6600_v1 }
0x1717   :  { %5734 = vmatprep.subr.mxu1 %v6204_v0 }
0x17d3   :  { %v2357_v16 = vpop.f32.mrf.mxu0 }
0x17d4   :  { %v2358_v18 = vadd.f32 %v6296_v24, %v2357_v16 }
0x17d5   :  { %v5717_v26 = vpop.f32.mrf.mxu0 }
0x17d6   :  { %v2362_v27 = vmin.f32 %v2358_v18, 0.0  ;;  %vm2361_vm9 = vcmp.gt.f32.partialorder %v2358_v18, 0.0 }
0x17d8   :  { %v2363_v20 = vmul.f32 1.442695, %v2362_v27 }
0x17da   :  { %6076 = vpow2.f32 %v2363_v20 }
0x17e7   :  { %v6077_v28 = vpop.eup %6076 }
0x17e8   :  { %v5147_v29 = vadd.f32 -1.0, %v6077_v28 }
0x17ea   :  { %v2366_v30 = vsel %vm2361_vm9, %v2358_v18, %v5147_v29 }
0x17eb   :  { %5727 = vmatmul.mubr.msk.f32.vlgmr.msra.gmra.mxu1 %vm190_vm2, %v2366_v30 }
0x17ec   :  { %5735 = vmatpush3.msra.mxu1 %v6244_v3  ;;  %5742 = vmatprep.mubr.msk.f32.mxu1 %vm6205_vm0, %v6204_v0  ;;  %v6619_v3 = vrot.slane %v86_v22, %v6313_v37 }
0x17ed   :  { %5736 = vmatprep.subr.mxu1 %v6204_v0 }
0x17ee   :  { %5737 = vmatpush3.msra.mxu1 %v6246_v4 }
0x17ef   :  { %5738 = vmatprep.subr.mxu1 %v6204_v0 }
0x17f0   :  { %5739 = vmatpush3.msra.mxu1 %v6250_v5 }
0x17f1   :  { %5740 = vmatprep.subr.mxu1 %v6204_v0 }
0x17f2   :  { %5741 = vmatpush3.msra.mxu1 %v6254_v6  ;;  %v6633_v6 = vld [vmem:[#allocation5 + $0x8] ss:$0 sm:$0xff] }
0x17f3   :  { %5756 = vmatprep.subr.mxu1 %v6204_v0 }
0x18ab   :  { %v2436_v17 = vpop.f32.mrf.mxu1 }
0x18ac   :  { %v2440_v31 = vadd.f32 %v2436_v17, %v2208_v63  ;;  %v6681_v63 = vld [vmem:[#allocation5 + $0x30] ss:$0 sm:$0xff] }
0x18ad   :  { %v5728_v32 = vpop.f32.mrf.mxu1 }
0x18ae   :  { %v2441_v4 = vadd.f32 %v2440_v31, %v6619_v3 }
0x18b0   :  { %5732 = vmatmul.mubr.msk.f32.vlgmr.msra.gmra.mxu0 %vm110_vm1, %v2441_v4 }
0x18b1   :  { %5746 = vmatpush3.msra.mxu0 %v6586_v12  ;;  %5753 = vmatprep.mubr.msk.f32.mxu0 %vm6205_vm0, %v6204_v0 }
0x18b2   :  { %5747 = vmatprep.subr.mxu0 %v6204_v0 }
0x18b3   :  { %5748 = vmatpush3.msra.mxu0 %v6590_v7 }
0x18b4   :  { %5749 = vmatprep.subr.mxu0 %v6204_v0 }
0x18b5   :  { %5750 = vmatpush3.msra.mxu0 %v6595_v25 }
0x18b6   :  { %5751 = vmatprep.subr.mxu0 %v6204_v0 }
0x18b7   :  { %5752 = vmatpush3.msra.mxu0 %v6600_v1 }
0x18b8   :  { %5761 = vmatprep.subr.mxu0 %v6204_v0 }
0x1970   :  { %v2511_v5 = vpop.f32.mrf.mxu0 }
0x1971   :  { %v2512_v35 = vadd.f32 %v6633_v6, %v2511_v5 }
0x1972   :  { %v5733_v33 = vpop.f32.mrf.mxu0 }
0x1973   :  { %v2516_v34 = vmin.f32 %v2512_v35, 0.0  ;;  %vm2515_vm10 = vcmp.gt.f32.partialorder %v2512_v35, 0.0 }
0x1975   :  { %v2517_v36 = vmul.f32 1.442695, %v2516_v34 }
0x1977   :  { %6078 = vpow2.f32 %v2517_v36 }
0x1984   :  { %v6079_v19 = vpop.eup %6078 }
0x1985   :  { %v5150_v21 = vadd.f32 -1.0, %v6079_v19 }
0x1987   :  { %v2520_v23 = vsel %vm2515_vm10, %v2512_v35, %v5150_v21 }
0x1988   :  { %5743 = vmatmul.mubr.msk.f32.vlgmr.msra.gmra.mxu1 %vm190_vm2, %v2520_v23 }
0x1989   :  { %5757 = vmatpush3.msra.mxu1 %v6637_v39  ;;  %5758 = vmatprep.mubr.msk.f32.mxu1 %vm6205_vm0, %v6204_v0 }
0x198a   :  { %5772 = vmatprep.subr.mxu1 %v6204_v0 }
0x1a48   :  { %v2590_v40 = vpop.f32.mrf.mxu1 }
0x1a49   :  { %v2591_v41 = vadd.f32 %v6296_v24, %v2590_v40  ;;  %v6651_v24 = vld [vmem:[#allocation5 + $0x20] sm:$0xff] }
0x1a4a   :  { %v5744_v42 = vpop.f32.mrf.mxu1 }
0x1a4b   :  { %v2595_v43 = vmin.f32 %v2591_v41, 0.0  ;;  %vm2594_vm11 = vcmp.gt.f32.partialorder %v2591_v41, 0.0 }
0x1a4d   :  { %v2596_v44 = vmul.f32 1.442695, %v2595_v43 }
0x1a4f   :  { %6080 = vpow2.f32 %v2596_v44 }
0x1a5c   :  { %v6081_v45 = vpop.eup %6080 }
0x1a5d   :  { %v5152_v46 = vadd.f32 -1.0, %v6081_v45 }
0x1a5f   :  { %v2599_v47 = vsel %vm2594_vm11, %v2591_v41, %v5152_v46 }
0x1a60   :  { %5754 = vmatmul.mubr.msk.f32.vlgmr.msra.gmra.mxu0 %vm190_vm2, %v2599_v47 }
0x1a61   :  { %5762 = vmatpush3.msra.mxu0 %v6645_v48  ;;  %5769 = vmatprep.mubr.msk.f32.mxu0 %vm6205_vm0, %v6204_v0 }
0x1a62   :  { %5763 = vmatprep.subr.mxu0 %v6204_v0 }
0x1a63   :  { %5764 = vmatpush3.msra.mxu0 %v6651_v24 }
0x1a64   :  { %5765 = vmatprep.subr.mxu0 %v6204_v0 }
0x1a65   :  { %5766 = vmatpush3.msra.mxu0 %v6655_v49 }
0x1a66   :  { %5767 = vmatprep.subr.mxu0 %v6204_v0 }
0x1a67   :  { %5768 = vmatpush3.msra.mxu0 %v6659_v50 }
0x1a68   :  { %5783 = vmatprep.subr.mxu0 %v6204_v0 }
0x1b20   :  { %v2669_v51 = vpop.f32.mrf.mxu0 }
0x1b21   :  { %v2673_v52 = vadd.f32 %v2669_v51, %v2441_v4 }
0x1b22   :  { %v5755_v53 = vpop.f32.mrf.mxu0 }
0x1b23   :  { %v2674_v54 = vadd.f32 %v2673_v52, %v6619_v3 }
0x1b25   :  { %5759 = vmatmul.mubr.msk.f32.vlgmr.msra.gmra.mxu1 %vm110_vm1, %v2674_v54 }
0x1b26   :  { %5773 = vmatpush3.msra.mxu1 %v6586_v12  ;;  %5780 = vmatprep.mubr.msk.f32.mxu1 %vm6205_vm0, %v6204_v0 }
0x1b27   :  { %5774 = vmatprep.subr.mxu1 %v6204_v0 }
0x1b28   :  { %5775 = vmatpush3.msra.mxu1 %v6590_v7 }
0x1b29   :  { %5776 = vmatprep.subr.mxu1 %v6204_v0 }
0x1b2a   :  { %5777 = vmatpush3.msra.mxu1 %v6595_v25 }
0x1b2b   :  { %5778 = vmatprep.subr.mxu1 %v6204_v0 }
0x1b2c   :  { %5779 = vmatpush3.msra.mxu1 %v6600_v1 }
0x1b2d   :  { %5788 = vmatprep.subr.mxu1 %v6204_v0 }
0x1be5   :  { %v2744_v55 = vpop.f32.mrf.mxu1 }
0x1be6   :  { %v2745_v56 = vadd.f32 %v6633_v6, %v2744_v55 }
0x1be7   :  { %v5760_v38 = vpop.f32.mrf.mxu1 }
0x1be8   :  { %v2749_v57 = vmin.f32 %v2745_v56, 0.0  ;;  %vm2748_vm12 = vcmp.gt.f32.partialorder %v2745_v56, 0.0 }
0x1bea   :  { %v2750_v58 = vmul.f32 1.442695, %v2749_v57 }
0x1bec   :  { %6082 = vpow2.f32 %v2750_v58 }
0x1bf9   :  { %v6083_v59 = vpop.eup %6082 }
0x1bfa   :  { %v5155_v60 = vadd.f32 -1.0, %v6083_v59 }
0x1bfc   :  { %v2753_v61 = vsel %vm2748_vm12, %v2745_v56, %v5155_v60 }
0x1bfd   :  { %5770 = vmatmul.mubr.msk.f32.vlgmr.msra.gmra.mxu0 %vm190_vm2, %v2753_v61 }
0x1bfe   :  { %5784 = vmatpush3.msra.mxu0 %v6637_v39  ;;  %5785 = vmatprep.mubr.msk.f32.mxu0 %vm6205_vm0, %v6204_v0 }
0x1bff   :  { %5799 = vmatprep.subr.mxu0 %v6204_v0 }
0x1cbd   :  { %v2823_v62 = vpop.f32.mrf.mxu0 }
0x1cbe   :  { %v2824_v2 = vadd.f32 %v6681_v63, %v2823_v62 }
0x1cbf   :  { %v5771_v8 = vpop.f32.mrf.mxu0 }
0x1cc0   :  { %v2828_v9 = vmin.f32 %v2824_v2, 0.0  ;;  %vm2827_vm13 = vcmp.gt.f32.partialorder %v2824_v2, 0.0 }
0x1cc2   :  { %v2829_v10 = vmul.f32 1.442695, %v2828_v9 }
0x1cc4   :  { %6084 = vpow2.f32 %v2829_v10 }
0x1cd1   :  { %v6085_v11 = vpop.eup %6084 }
0x1cd2   :  { %v5157_v13 = vadd.f32 -1.0, %v6085_v11 }
0x1cd4   :  { %v2832_v14 = vsel %vm2827_vm13, %v2824_v2, %v5157_v13 }
0x1cd5   :  { %5781 = vmatmul.mubr.msk.f32.vlgmr.msra.gmra.mxu1 %vm190_vm2, %v2832_v14 }
0x1cd6   :  { %5789 = vmatpush3.msra.mxu1 %v6645_v48  ;;  %5796 = vmatprep.mubr.msk.f32.mxu1 %vm6205_vm0, %v6204_v0 }
0x1cd7   :  { %5790 = vmatprep.subr.mxu1 %v6204_v0 }
0x1cd8   :  { %5791 = vmatpush3.msra.mxu1 %v6651_v24 }
0x1cd9   :  { %5792 = vmatprep.subr.mxu1 %v6204_v0 }
0x1cda   :  { %5793 = vmatpush3.msra.mxu1 %v6655_v49 }
0x1cdb   :  { %5794 = vmatprep.subr.mxu1 %v6204_v0 }
0x1cdc   :  { %5795 = vmatpush3.msra.mxu1 %v6659_v50 }
0x1cdd   :  { %5810 = vmatprep.subr.mxu1 %v6204_v0 }
0x1d95   :  { %v2902_v15 = vpop.f32.mrf.mxu1 }
0x1d96   :  { %v2906_v16 = vadd.f32 %v2902_v15, %v2674_v54 }
0x1d97   :  { %v5782_v18 = vpop.f32.mrf.mxu1 }
0x1d98   :  { %v2907_v26 = vadd.f32 %v2906_v16, %v6619_v3 }
0x1d9a   :  { %5786 = vmatmul.mubr.msk.f32.vlgmr.msra.gmra.mxu0 %vm110_vm1, %v2907_v26 }
0x1d9b   :  { %5800 = vmatpush3.msra.mxu0 %v6586_v12  ;;  %5807 = vmatprep.mubr.msk.f32.mxu0 %vm6205_vm0, %v6204_v0 }
0x1d9c   :  { %5801 = vmatprep.subr.mxu0 %v6204_v0 }
0x1d9d   :  { %5802 = vmatpush3.msra.mxu0 %v6590_v7 }
0x1d9e   :  { %5803 = vmatprep.subr.mxu0 %v6204_v0 }
0x1d9f   :  { %5804 = vmatpush3.msra.mxu0 %v6595_v25 }
0x1da0   :  { %5805 = vmatprep.subr.mxu0 %v6204_v0 }
0x1da1   :  { %5806 = vmatpush3.msra.mxu0 %v6600_v1 }
0x1da2   :  { %5815 = vmatprep.subr.mxu0 %v6204_v0 }
0x1e5a   :  { %v2977_v27 = vpop.f32.mrf.mxu0 }
0x1e5b   :  { %v2978_v20 = vadd.f32 %v6633_v6, %v2977_v27 }
0x1e5c   :  { %v5787_v28 = vpop.f32.mrf.mxu0 }
0x1e5d   :  { %v2982_v29 = vmin.f32 %v2978_v20, 0.0  ;;  %vm2981_vm14 = vcmp.gt.f32.partialorder %v2978_v20, 0.0 }
0x1e5f   :  { %v2983_v30 = vmul.f32 1.442695, %v2982_v29 }
0x1e61   :  { %6086 = vpow2.f32 %v2983_v30 }
0x1e6e   :  { %v6087_v22 = vpop.eup %6086 }
0x1e6f   :  { %v5160_v17 = vadd.f32 -1.0, %v6087_v22 }
0x1e71   :  { %v2986_v31 = vsel %vm2981_vm14, %v2978_v20, %v5160_v17 }
0x1e72   :  { %5797 = vmatmul.mubr.msk.f32.vlgmr.msra.gmra.mxu1 %vm190_vm2, %v2986_v31 }
0x1e73   :  { %5811 = vmatpush3.msra.mxu1 %v6637_v39  ;;  %5812 = vmatprep.mubr.msk.f32.mxu1 %vm6205_vm0, %v6204_v0 }
0x1e74   :  { %5826 = vmatprep.subr.mxu1 %v6204_v0 }
0x1f32   :  { %v3056_v32 = vpop.f32.mrf.mxu1 }
0x1f33   :  { %v3057_v4 = vadd.f32 %v6681_v63, %v3056_v32 }
0x1f34   :  { %v5798_v5 = vpop.f32.mrf.mxu1 }
0x1f35   :  { %v3061_v35 = vmin.f32 %v3057_v4, 0.0  ;;  %vm3060_vm15 = vcmp.gt.f32.partialorder %v3057_v4, 0.0 }
0x1f37   :  { %v3062_v33 = vmul.f32 1.442695, %v3061_v35 }
0x1f39   :  { %6088 = vpow2.f32 %v3062_v33 }
0x1f46   :  { %v6089_v34 = vpop.eup %6088 }
0x1f47   :  { %v5162_v36 = vadd.f32 -1.0, %v6089_v34 }
0x1f49   :  { %v3065_v19 = vsel %vm3060_vm15, %v3057_v4, %v5162_v36 }
0x1f4a   :  { %5808 = vmatmul.mubr.msk.f32.vlgmr.msra.gmra.mxu0 %vm190_vm2, %v3065_v19  ;;  %v6801_v19 = vld [vmem:[#allocation5 + $0x48] sm:$0xff] }
0x1f4b   :  { %5816 = vmatpush3.msra.mxu0 %v6645_v48  ;;  %5823 = vmatprep.mubr.msk.f32.mxu0 %vm6205_vm0, %v6204_v0 }
0x1f4c   :  { %5817 = vmatprep.subr.mxu0 %v6204_v0 }
0x1f4d   :  { %5818 = vmatpush3.msra.mxu0 %v6651_v24 }
0x1f4e   :  { %5819 = vmatprep.subr.mxu0 %v6204_v0 }
0x1f4f   :  { %5820 = vmatpush3.msra.mxu0 %v6655_v49 }
0x1f50   :  { %5821 = vmatprep.subr.mxu0 %v6204_v0 }
0x1f51   :  { %5822 = vmatpush3.msra.mxu0 %v6659_v50 }
0x1f52   :  { %5837 = vmatprep.subr.mxu0 %v6204_v0 }
0x200a   :  { %v3135_v21 = vpop.f32.mrf.mxu0 }
0x200b   :  { %v3139_v23 = vadd.f32 %v3135_v21, %v2907_v26  ;;  %v6804_v21 = vmul.f32 0.047619063, %v6801_v19 }
0x200c   :  { %v5809_v40 = vpop.f32.mrf.mxu0 }
0x200d   :  { %v3140_v41 = vadd.f32 %v3139_v23, %v6619_v3  ;;  %v6808_v23 = vld [vmem:[#allocation5 + $0x40] sm:$0xff] }
0x200e   :  { %v6811_v40 = vmul.f32 0.047619063, %v6808_v23 }
0x200f   :  { %5813 = vmatmul.mubr.msk.f32.vlgmr.msra.gmra.mxu1 %vm110_vm1, %v3140_v41 }
0x2010   :  { %5827 = vmatpush3.msra.mxu1 %v6586_v12  ;;  %5834 = vmatprep.mubr.msk.f32.mxu1 %vm6205_vm0, %v6204_v0 }
0x2011   :  { %5828 = vmatprep.subr.mxu1 %v6204_v0 }
0x2012   :  { %5829 = vmatpush3.msra.mxu1 %v6590_v7 }
0x2013   :  { %5830 = vmatprep.subr.mxu1 %v6204_v0 }
0x2014   :  { %5831 = vmatpush3.msra.mxu1 %v6595_v25 }
0x2015   :  { %5832 = vmatprep.subr.mxu1 %v6204_v0 }
0x2016   :  { %5833 = vmatpush3.msra.mxu1 %v6600_v1 }
0x2017   :  { %5842 = vmatprep.subr.mxu1 %v6204_v0 }
0x20cf   :  { %v3210_v42 = vpop.f32.mrf.mxu1 }
0x20d0   :  { %v3211_v43 = vadd.f32 %v6633_v6, %v3210_v42 }
0x20d1   :  { %v5814_v44 = vpop.f32.mrf.mxu1 }
0x20d2   :  { %v3215_v45 = vmin.f32 %v3211_v43, 0.0  ;;  %vm3214_vm3 = vcmp.gt.f32.partialorder %v3211_v43, 0.0 }
0x20d4   :  { %v3216_v46 = vmul.f32 1.442695, %v3215_v45 }
0x20d6   :  { %6090 = vpow2.f32 %v3216_v46 }
0x20e3   :  { %v6091_v47 = vpop.eup %6090 }
0x20e4   :  { %v5165_v51 = vadd.f32 -1.0, %v6091_v47 }
0x20e6   :  { %v3219_v52 = vsel %vm3214_vm3, %v3211_v43, %v5165_v51 }
0x20e7   :  { %5824 = vmatmul.mubr.msk.f32.vlgmr.msra.gmra.mxu0 %vm190_vm2, %v3219_v52 }
0x20e8   :  { %5838 = vmatpush3.msra.mxu0 %v6637_v39  ;;  %5839 = vmatprep.mubr.msk.f32.mxu0 %vm6205_vm0, %v6204_v0 }
0x20e9   :  { %5853 = vmatprep.subr.mxu0 %v6204_v0 }
0x21a7   :  { %v3289_v53 = vpop.f32.mrf.mxu0 }
0x21a8   :  { %v3290_v54 = vadd.f32 %v6681_v63, %v3289_v53 }
0x21a9   :  { %v5825_v55 = vpop.f32.mrf.mxu0 }
0x21aa   :  { %v3294_v56 = vmin.f32 %v3290_v54, 0.0  ;;  %vm3293_vm4 = vcmp.gt.f32.partialorder %v3290_v54, 0.0 }
0x21ac   :  { %v3295_v38 = vmul.f32 1.442695, %v3294_v56 }
0x21ae   :  { %6092 = vpow2.f32 %v3295_v38 }
0x21bb   :  { %v6093_v57 = vpop.eup %6092 }
0x21bc   :  { %v5167_v58 = vadd.f32 -1.0, %v6093_v57 }
0x21be   :  { %v3298_v59 = vsel %vm3293_vm4, %v3290_v54, %v5167_v58  ;;  %v6835_v54 = vld [vmem:[#allocation5 + $0x58] sm:$0x1] }
0x21bf   :  { %5835 = vmatmul.mubr.msk.f32.vlgmr.msra.gmra.mxu1 %vm190_vm2, %v3298_v59  ;;  %v95_v55 = vmul.f32 0.047619063, %v6835_v54 }
0x21c0   :  { %5843 = vmatpush3.msra.mxu1 %v6645_v48  ;;  %5850 = vmatprep.mubr.msk.f32.mxu1 %vm6205_vm0, %v6204_v0 }
0x21c1   :  { %5844 = vmatprep.subr.mxu1 %v6204_v0  ;;  %v6839_v56 = vrot.slane %v95_v55, %v6313_v37 }
0x21c2   :  { %5845 = vmatpush3.msra.mxu1 %v6651_v24 }
0x21c3   :  { %5846 = vmatprep.subr.mxu1 %v6204_v0 }
0x21c4   :  { %5847 = vmatpush3.msra.mxu1 %v6655_v49 }
0x21c5   :  { %5848 = vmatprep.subr.mxu1 %v6204_v0 }
0x21c6   :  { %5849 = vmatpush3.msra.mxu1 %v6659_v50 }
0x21c7   :  { %5864 = vmatprep.subr.mxu1 %v6204_v0 }
0x227f   :  { %v3368_v60 = vpop.f32.mrf.mxu1 }
0x2280   :  { %v3372_v61 = vadd.f32 %v3368_v60, %v3140_v41  ;;  %v6815_v41 = vld [vmem:[#allocation5 + $0x38] sm:$0xff] }
0x2281   :  { %v5836_v62 = vpop.f32.mrf.mxu1  ;;  %v6818_v42 = vmul.f32 0.047619063, %v6815_v41 }
0x2282   :  { %v3373_v2 = vadd.f32 %v3372_v61, %v6619_v3 }
0x2284   :  { %5840 = vmatmul.mubr.msk.f32.vlgmr.msra.gmra.mxu0 %vm110_vm1, %v3373_v2 }
0x2285   :  { %5854 = vmatpush3.msra.mxu0 %v6586_v12  ;;  %5861 = vmatprep.mubr.msk.f32.mxu0 %vm6205_vm0, %v6204_v0 }
0x2286   :  { %5855 = vmatprep.subr.mxu0 %v6204_v0 }
0x2287   :  { %5856 = vmatpush3.msra.mxu0 %v6590_v7 }
0x2288   :  { %5857 = vmatprep.subr.mxu0 %v6204_v0 }
0x2289   :  { %5858 = vmatpush3.msra.mxu0 %v6595_v25 }
0x228a   :  { %5859 = vmatprep.subr.mxu0 %v6204_v0 }
0x228b   :  { %5860 = vmatpush3.msra.mxu0 %v6600_v1 }
0x228c   :  { %5869 = vmatprep.subr.mxu0 %v6204_v0 }
0x2344   :  { %v3443_v8 = vpop.f32.mrf.mxu0 }
0x2345   :  { %v3444_v12 = vadd.f32 %v6633_v6, %v3443_v8 }
0x2346   :  { %v5841_v9 = vpop.f32.mrf.mxu0 }
0x2347   :  { %v3448_v10 = vmin.f32 %v3444_v12, 0.0  ;;  %vm3447_vm5 = vcmp.gt.f32.partialorder %v3444_v12, 0.0 }
0x2349   :  { %v3449_v11 = vmul.f32 1.442695, %v3448_v10 }
0x234b   :  { %6094 = vpow2.f32 %v3449_v11 }
0x2358   :  { %v6095_v13 = vpop.eup %6094 }
0x2359   :  { %v5170_v14 = vadd.f32 -1.0, %v6095_v13 }
0x235b   :  { %v3452_v7 = vsel %vm3447_vm5, %v3444_v12, %v5170_v14 }
0x235c   :  { %5851 = vmatmul.mubr.msk.f32.vlgmr.msra.gmra.mxu1 %vm190_vm2, %v3452_v7 }
0x235d   :  { %5865 = vmatpush3.msra.mxu1 %v6637_v39  ;;  %5866 = vmatprep.mubr.msk.f32.mxu1 %vm6205_vm0, %v6204_v0 }
0x235e   :  { %5880 = vmatprep.subr.mxu1 %v6204_v0 }
0x241c   :  { %v3522_v25 = vpop.f32.mrf.mxu1 }
0x241d   :  { %v3523_v1 = vadd.f32 %v6681_v63, %v3522_v25 }
0x241e   :  { %v5852_v15 = vpop.f32.mrf.mxu1 }
0x241f   :  { %v3527_v16 = vmin.f32 %v3523_v1, 0.0  ;;  %vm3526_vm6 = vcmp.gt.f32.partialorder %v3523_v1, 0.0 }
0x2421   :  { %v3528_v18 = vmul.f32 1.442695, %v3527_v16 }
0x2423   :  { %6096 = vpow2.f32 %v3528_v18 }
0x2430   :  { %v6097_v26 = vpop.eup %6096 }
0x2431   :  { %v5172_v27 = vadd.f32 -1.0, %v6097_v26 }
0x2433   :  { %v3531_v20 = vsel %vm3526_vm6, %v3523_v1, %v5172_v27 }
0x2434   :  { %5862 = vmatmul.mubr.msk.f32.vlgmr.msra.gmra.mxu0 %vm190_vm2, %v3531_v20 }
0x2435   :  { %5870 = vmatpush3.msra.mxu0 %v6645_v48  ;;  %5877 = vmatprep.mubr.msk.f32.mxu0 %vm6205_vm0, %v6204_v0 }
0x2436   :  { %5871 = vmatprep.subr.mxu0 %v6204_v0 }
0x2437   :  { %5872 = vmatpush3.msra.mxu0 %v6651_v24 }
0x2438   :  { %5873 = vmatprep.subr.mxu0 %v6204_v0 }
0x2439   :  { %5874 = vmatpush3.msra.mxu0 %v6655_v49 }
0x243a   :  { %5875 = vmatprep.subr.mxu0 %v6204_v0 }
0x243b   :  { %5876 = vmatpush3.msra.mxu0 %v6659_v50 }
0x243c   :  { %5891 = vmatprep.subr.mxu0 %v6204_v0 }
0x24f4   :  { %v3601_v28 = vpop.f32.mrf.mxu0 }
0x24f5   :  { %v3605_v29 = vadd.f32 %v3601_v28, %v3373_v2 }
0x24f6   :  { %v5863_v30 = vpop.f32.mrf.mxu0 }
0x24f7   :  { %v3606_v22 = vadd.f32 %v3605_v29, %v6619_v3  ;;  %v6795_v3 = vld [vmem:[#allocation5 + $0x50] sm:$0xff] }
0x24f8   :  { %v6798_v36 = vmul.f32 0.047619063, %v6795_v3 }
0x24f9   :  { %5867 = vmatmul.mubr.msk.f32.vlgmr.msra.gmra.mxu1 %vm110_vm1, %v3606_v22 }
0x24fa   :  { %5888 = vmatprep.mubr.msk.f32.mxu1 %vm6205_vm0, %v6204_v0  ;;  %5881 = vmatpush3.msra.mxu1 %v6798_v36 }
0x24fb   :  { %5882 = vmatprep.subr.mxu1 %v6204_v0 }
0x24fc   :  { %5883 = vmatpush3.msra.mxu1 %v6804_v21 }
0x24fd   :  { %5884 = vmatprep.subr.mxu1 %v6204_v0 }
0x24fe   :  { %5885 = vmatpush3.msra.mxu1 %v6811_v40 }
0x24ff   :  { %5886 = vmatprep.subr.mxu1 %v6204_v0 }
0x2500   :  { %5887 = vmatpush3.msra.mxu1 %v6818_v42 }
0x2501   :  { %5896 = vmatprep.subr.mxu1 %v6204_v0 }
0x25b9   :  { %v3676_v17 = vpop.f32.mrf.mxu1 }
0x25ba   :  { %v3677_v31 = vadd.f32 %v6633_v6, %v3676_v17 }
0x25bb   :  { %v5868_v32 = vpop.f32.mrf.mxu1 }
0x25bc   :  { %v3681_v4 = vmin.f32 %v3677_v31, 0.0  ;;  %vm3680_vm7 = vcmp.gt.f32.partialorder %v3677_v31, 0.0 }
0x25be   :  { %v3682_v5 = vmul.f32 1.442695, %v3681_v4 }
0x25c0   :  { %6098 = vpow2.f32 %v3682_v5 }
0x25cd   :  { %v6099_v35 = vpop.eup %6098 }
0x25ce   :  { %v5175_v33 = vadd.f32 -1.0, %v6099_v35 }
0x25d0   :  { %v3685_v34 = vsel %vm3680_vm7, %v3677_v31, %v5175_v33 }
0x25d1   :  { %5878 = vmatmul.mubr.msk.f32.vlgmr.msra.gmra.mxu0 %vm190_vm2, %v3685_v34 }
0x25d2   :  { %5892 = vmatpush3.msra.mxu0 %v6637_v39  ;;  %5893 = vmatprep.mubr.msk.f32.mxu0 %vm6205_vm0, %v6204_v0 }
0x25d3   :  { %5907 = vmatprep.subr.mxu0 %v6204_v0 }
0x2691   :  { %v3755_v43 = vpop.f32.mrf.mxu0 }
0x2692   :  { %v3756_v44 = vadd.f32 %v6681_v63, %v3755_v43 }
0x2693   :  { %v5879_v45 = vpop.f32.mrf.mxu0 }
0x2694   :  { %v3760_v46 = vmin.f32 %v3756_v44, 0.0  ;;  %vm3759_vm8 = vcmp.gt.f32.partialorder %v3756_v44, 0.0 }
0x2696   :  { %v3761_v47 = vmul.f32 1.442695, %v3760_v46 }
0x2698   :  { %6100 = vpow2.f32 %v3761_v47 }
0x26a5   :  { %v6101_v51 = vpop.eup %6100 }
0x26a6   :  { %v5177_v52 = vadd.f32 -1.0, %v6101_v51 }
0x26a8   :  { %v3764_v53 = vsel %vm3759_vm8, %v3756_v44, %v5177_v52 }
0x26a9   :  { %5889 = vmatmul.mubr.msk.f32.vlgmr.msra.gmra.mxu1 %vm190_vm2, %v3764_v53 }
0x26aa   :  { %5897 = vmatpush3.msra.mxu1 %v6645_v48  ;;  %5904 = vmatprep.mubr.msk.f32.mxu1 %vm6205_vm0, %v6204_v0 }
0x26ab   :  { %5898 = vmatprep.subr.mxu1 %v6204_v0 }
0x26ac   :  { %5899 = vmatpush3.msra.mxu1 %v6651_v24 }
0x26ad   :  { %5900 = vmatprep.subr.mxu1 %v6204_v0 }
0x26ae   :  { %5901 = vmatpush3.msra.mxu1 %v6655_v49 }
0x26af   :  { %5902 = vmatprep.subr.mxu1 %v6204_v0 }
0x26b0   :  { %5903 = vmatpush3.msra.mxu1 %v6659_v50 }
0x26b1   :  { %5918 = vmatprep.subr.mxu1 %v6204_v0 }
0x2769   :  { %v3834_v38 = vpop.f32.mrf.mxu1 }
0x276a   :  { %v3838_v57 = vadd.f32 %v3834_v38, %v3606_v22 }
0x276b   :  { %v5890_v58 = vpop.f32.mrf.mxu1 }
0x276c   :  { %v3839_v59 = vadd.f32 %v3838_v57, %v6839_v56 }
0x276e   :  { %5894 = vmatmul.mubr.msk.f32.vlgmr.msra.gmra.mxu0 %vm110_vm1, %v3839_v59 }
0x276f   :  { %5908 = vmatpush3.msra.mxu0 %v6798_v36  ;;  %5915 = vmatprep.mubr.msk.f32.mxu0 %vm6205_vm0, %v6204_v0 }
0x2770   :  { %5909 = vmatprep.subr.mxu0 %v6204_v0 }
0x2771   :  { %5910 = vmatpush3.msra.mxu0 %v6804_v21 }
0x2772   :  { %5911 = vmatprep.subr.mxu0 %v6204_v0 }
0x2773   :  { %5912 = vmatpush3.msra.mxu0 %v6811_v40 }
0x2774   :  { %5913 = vmatprep.subr.mxu0 %v6204_v0 }
0x2775   :  { %5914 = vmatpush3.msra.mxu0 %v6818_v42 }
0x2776   :  { %5923 = vmatprep.subr.mxu0 %v6204_v0 }
0x282e   :  { %v3909_v60 = vpop.f32.mrf.mxu0 }
0x282f   :  { %v3910_v61 = vadd.f32 %v6633_v6, %v3909_v60  ;;  %v6921_v60 = vmul.f32 0.047619026, %v6808_v23 }
0x2830   :  { %v5895_v62 = vpop.f32.mrf.mxu0 }
0x2831   :  { %v3914_v2 = vmin.f32 %v3910_v61, 0.0  ;;  %vm3913_vm9 = vcmp.gt.f32.partialorder %v3910_v61, 0.0 }
0x2833   :  { %v3915_v8 = vmul.f32 1.442695, %v3914_v2 }
0x2835   :  { %6102 = vpow2.f32 %v3915_v8 }
0x2842   :  { %v6103_v12 = vpop.eup %6102 }
0x2843   :  { %v5180_v9 = vadd.f32 -1.0, %v6103_v12 }
0x2845   :  { %v3918_v10 = vsel %vm3913_vm9, %v3910_v61, %v5180_v9  ;;  %v6926_v61 = vmul.f32 0.047619026, %v6815_v41  ;;  %v104_v41 = vmul.f32 0.047619026, %v6835_v54 }
0x2846   :  { %5905 = vmatmul.mubr.msk.f32.vlgmr.msra.gmra.mxu1 %vm190_vm2, %v3918_v10 }
0x2847   :  { %5919 = vmatpush3.msra.mxu1 %v6637_v39  ;;  %5920 = vmatprep.mubr.msk.f32.mxu1 %vm6205_vm0, %v6204_v0  ;;  %v6945_v10 = vrot.slane %v104_v41, %v6313_v37 }
0x2848   :  { %5934 = vmatprep.subr.mxu1 %v6204_v0 }
0x2906   :  { %v3988_v11 = vpop.f32.mrf.mxu1 }
0x2907   :  { %v3989_v13 = vadd.f32 %v6681_v63, %v3988_v11 }
0x2908   :  { %v5906_v14 = vpop.f32.mrf.mxu1 }
0x2909   :  { %v3993_v7 = vmin.f32 %v3989_v13, 0.0  ;;  %vm3992_vm10 = vcmp.gt.f32.partialorder %v3989_v13, 0.0 }
0x290b   :  { %v3994_v25 = vmul.f32 1.442695, %v3993_v7 }
0x290d   :  { %6104 = vpow2.f32 %v3994_v25 }
0x291a   :  { %v6105_v1 = vpop.eup %6104 }
0x291b   :  { %v5182_v15 = vadd.f32 -1.0, %v6105_v1 }
0x291d   :  { %v3997_v16 = vsel %vm3992_vm10, %v3989_v13, %v5182_v15 }
0x291e   :  { %5916 = vmatmul.mubr.msk.f32.vlgmr.msra.gmra.mxu0 %vm190_vm2, %v3997_v16 }
0x291f   :  { %5924 = vmatpush3.msra.mxu0 %v6645_v48  ;;  %5931 = vmatprep.mubr.msk.f32.mxu0 %vm6205_vm0, %v6204_v0 }
0x2920   :  { %5925 = vmatprep.subr.mxu0 %v6204_v0 }
0x2921   :  { %5926 = vmatpush3.msra.mxu0 %v6651_v24 }
0x2922   :  { %5927 = vmatprep.subr.mxu0 %v6204_v0 }
0x2923   :  { %5928 = vmatpush3.msra.mxu0 %v6655_v49 }
0x2924   :  { %5929 = vmatprep.subr.mxu0 %v6204_v0 }
0x2925   :  { %5930 = vmatpush3.msra.mxu0 %v6659_v50 }
0x2926   :  { %5945 = vmatprep.subr.mxu0 %v6204_v0 }
0x29de   :  { %v4067_v18 = vpop.f32.mrf.mxu0 }
0x29df   :  { %v4071_v26 = vadd.f32 %v4067_v18, %v3839_v59  ;;  %v6916_v59 = vmul.f32 0.047619026, %v6801_v19 }
0x29e0   :  { %v5917_v27 = vpop.f32.mrf.mxu0 }
0x29e1   :  { %v4072_v20 = vadd.f32 %v4071_v26, %v6839_v56 }
0x29e3   :  { %5921 = vmatmul.mubr.msk.f32.vlgmr.msra.gmra.mxu1 %vm110_vm1, %v4072_v20 }
0x29e4   :  { %5935 = vmatpush3.msra.mxu1 %v6798_v36  ;;  %5942 = vmatprep.mubr.msk.f32.mxu1 %vm6205_vm0, %v6204_v0 }
0x29e5   :  { %5936 = vmatprep.subr.mxu1 %v6204_v0 }
0x29e6   :  { %5937 = vmatpush3.msra.mxu1 %v6804_v21 }
0x29e7   :  { %5938 = vmatprep.subr.mxu1 %v6204_v0 }
0x29e8   :  { %5939 = vmatpush3.msra.mxu1 %v6811_v40 }
0x29e9   :  { %5940 = vmatprep.subr.mxu1 %v6204_v0 }
0x29ea   :  { %5941 = vmatpush3.msra.mxu1 %v6818_v42 }
0x29eb   :  { %5950 = vmatprep.subr.mxu1 %v6204_v0 }
0x2aa3   :  { %v4142_v28 = vpop.f32.mrf.mxu1 }
0x2aa4   :  { %v4143_v29 = vadd.f32 %v6633_v6, %v4142_v28 }
0x2aa5   :  { %v5922_v30 = vpop.f32.mrf.mxu1 }
0x2aa6   :  { %v4147_v22 = vmin.f32 %v4143_v29, 0.0  ;;  %vm4146_vm11 = vcmp.gt.f32.partialorder %v4143_v29, 0.0 }
0x2aa8   :  { %v4148_v17 = vmul.f32 1.442695, %v4147_v22 }
0x2aaa   :  { %6106 = vpow2.f32 %v4148_v17 }
0x2ab7   :  { %v6107_v31 = vpop.eup %6106 }
0x2ab8   :  { %v5185_v32 = vadd.f32 -1.0, %v6107_v31 }
0x2aba   :  { %v4151_v4 = vsel %vm4146_vm11, %v4143_v29, %v5185_v32 }
0x2abb   :  { %5932 = vmatmul.mubr.msk.f32.vlgmr.msra.gmra.mxu0 %vm190_vm2, %v4151_v4 }
0x2abc   :  { %5946 = vmatpush3.msra.mxu0 %v6637_v39  ;;  %5947 = vmatprep.mubr.msk.f32.mxu0 %vm6205_vm0, %v6204_v0 }
0x2abd   :  { %5961 = vmatprep.subr.mxu0 %v6204_v0 }
0x2b7b   :  { %v4221_v5 = vpop.f32.mrf.mxu0 }
0x2b7c   :  { %v4222_v35 = vadd.f32 %v6681_v63, %v4221_v5 }
0x2b7d   :  { %v5933_v33 = vpop.f32.mrf.mxu0 }
0x2b7e   :  { %v4226_v34 = vmin.f32 %v4222_v35, 0.0  ;;  %vm4225_vm12 = vcmp.gt.f32.partialorder %v4222_v35, 0.0 }
0x2b80   :  { %v4227_v36 = vmul.f32 1.442695, %v4226_v34 }
0x2b82   :  { %6108 = vpow2.f32 %v4227_v36 }
0x2b8f   :  { %v6109_v21 = vpop.eup %6108 }
0x2b90   :  { %v5187_v40 = vadd.f32 -1.0, %v6109_v21 }
0x2b92   :  { %v4230_v42 = vsel %vm4225_vm12, %v4222_v35, %v5187_v40 }
0x2b93   :  { %5943 = vmatmul.mubr.msk.f32.vlgmr.msra.gmra.mxu1 %vm190_vm2, %v4230_v42 }
0x2b94   :  { %5951 = vmatpush3.msra.mxu1 %v6645_v48  ;;  %5958 = vmatprep.mubr.msk.f32.mxu1 %vm6205_vm0, %v6204_v0 }
0x2b95   :  { %5952 = vmatprep.subr.mxu1 %v6204_v0 }
0x2b96   :  { %5953 = vmatpush3.msra.mxu1 %v6651_v24 }
0x2b97   :  { %5954 = vmatprep.subr.mxu1 %v6204_v0 }
0x2b98   :  { %5955 = vmatpush3.msra.mxu1 %v6655_v49 }
0x2b99   :  { %5956 = vmatprep.subr.mxu1 %v6204_v0 }
0x2b9a   :  { %5957 = vmatpush3.msra.mxu1 %v6659_v50 }
0x2b9b   :  { %5972 = vmatprep.subr.mxu1 %v6204_v0 }
0x2c53   :  { %v4300_v43 = vpop.f32.mrf.mxu1 }
0x2c54   :  { %v4304_v44 = vadd.f32 %v4300_v43, %v4072_v20 }
0x2c55   :  { %v5944_v45 = vpop.f32.mrf.mxu1 }
0x2c56   :  { %v4305_v46 = vadd.f32 %v4304_v44, %v6839_v56  ;;  %v6912_v56 = vmul.f32 0.047619026, %v6795_v3 }
0x2c58   :  { %5948 = vmatmul.mubr.msk.f32.vlgmr.msra.gmra.mxu0 %vm110_vm1, %v4305_v46 }
0x2c59   :  { %5969 = vmatprep.mubr.msk.f32.mxu0 %vm6205_vm0, %v6204_v0  ;;  %5962 = vmatpush3.msra.mxu0 %v6912_v56 }
0x2c5a   :  { %5963 = vmatprep.subr.mxu0 %v6204_v0 }
0x2c5b   :  { %5964 = vmatpush3.msra.mxu0 %v6916_v59 }
0x2c5c   :  { %5965 = vmatprep.subr.mxu0 %v6204_v0 }
0x2c5d   :  { %5966 = vmatpush3.msra.mxu0 %v6921_v60 }
0x2c5e   :  { %5967 = vmatprep.subr.mxu0 %v6204_v0 }
0x2c5f   :  { %5968 = vmatpush3.msra.mxu0 %v6926_v61 }
0x2c60   :  { %5977 = vmatprep.subr.mxu0 %v6204_v0 }
0x2d18   :  { %v4375_v47 = vpop.f32.mrf.mxu0 }
0x2d19   :  { %v4376_v51 = vadd.f32 %v6633_v6, %v4375_v47  ;;  %v47_v47 = vld [vmem:[#allocation5 + $0x60] sm:$0xff] }
0x2d1a   :  { %v5949_v52 = vpop.f32.mrf.mxu0 }
0x2d1b   :  { %v4380_v53 = vmin.f32 %v4376_v51, 0.0  ;;  %vm4379_vm13 = vcmp.gt.f32.partialorder %v4376_v51, 0.0 }
0x2d1d   :  { %v4381_v55 = vmul.f32 1.442695, %v4380_v53 }
0x2d1f   :  { %6110 = vpow2.f32 %v4381_v55 }
0x2d2c   :  { %v6111_v38 = vpop.eup %6110 }
0x2d2d   :  { %v5190_v57 = vadd.f32 -1.0, %v6111_v38 }
0x2d2f   :  { %v4384_v58 = vsel %vm4379_vm13, %v4376_v51, %v5190_v57 }
0x2d30   :  { %5959 = vmatmul.mubr.msk.f32.vlgmr.msra.gmra.mxu1 %vm190_vm2, %v4384_v58 }
0x2d31   :  { %5973 = vmatpush3.msra.mxu1 %v6637_v39  ;;  %5974 = vmatprep.mubr.msk.f32.mxu1 %vm6205_vm0, %v6204_v0 }
0x2d32   :  { %5988 = vmatprep.subr.mxu1 %v6204_v0 }
0x2df0   :  { %v4454_v3 = vpop.f32.mrf.mxu1 }
0x2df1   :  { %v4455_v19 = vadd.f32 %v6681_v63, %v4454_v3 }
0x2df2   :  { %v5960_v62 = vpop.f32.mrf.mxu1 }
0x2df3   :  { %v4459_v2 = vmin.f32 %v4455_v19, 0.0  ;;  %vm4458_vm14 = vcmp.gt.f32.partialorder %v4455_v19, 0.0 }
0x2df5   :  { %v4460_v23 = vmul.f32 1.442695, %v4459_v2 }
0x2df7   :  { %6112 = vpow2.f32 %v4460_v23 }
0x2e04   :  { %v6113_v8 = vpop.eup %6112 }
0x2e05   :  { %v5192_v12 = vadd.f32 -1.0, %v6113_v8 }
0x2e07   :  { %v4463_v9 = vsel %vm4458_vm14, %v4455_v19, %v5192_v12 }
0x2e08   :  { %5970 = vmatmul.mubr.msk.f32.vlgmr.msra.gmra.mxu0 %vm190_vm2, %v4463_v9 }
0x2e09   :  { %5978 = vmatpush3.msra.mxu0 %v6645_v48  ;;  %5985 = vmatprep.mubr.msk.f32.mxu0 %vm6205_vm0, %v6204_v0 }
0x2e0a   :  { %5979 = vmatprep.subr.mxu0 %v6204_v0 }
0x2e0b   :  { %5980 = vmatpush3.msra.mxu0 %v6651_v24 }
0x2e0c   :  { %5981 = vmatprep.subr.mxu0 %v6204_v0 }
0x2e0d   :  { %5982 = vmatpush3.msra.mxu0 %v6655_v49 }
0x2e0e   :  { %5983 = vmatprep.subr.mxu0 %v6204_v0 }
0x2e0f   :  { %5984 = vmatpush3.msra.mxu0 %v6659_v50 }
0x2e10   :  { %5999 = vmatprep.subr.mxu0 %v6204_v0 }
0x2ec8   :  { %v4533_v11 = vpop.f32.mrf.mxu0 }
0x2ec9   :  { %v4537_v13 = vadd.f32 %v4533_v11, %v4305_v46 }
0x2eca   :  { %v5971_v14 = vpop.f32.mrf.mxu0 }
0x2ecb   :  { %v4538_v7 = vadd.f32 %v4537_v13, %v6945_v10 }
0x2ecd   :  { %5975 = vmatmul.mubr.msk.f32.vlgmr.msra.gmra.mxu1 %vm110_vm1, %v4538_v7 }
0x2ece   :  { %5989 = vmatpush3.msra.mxu1 %v6912_v56  ;;  %5996 = vmatprep.mubr.msk.f32.mxu1 %vm6205_vm0, %v6204_v0 }
0x2ecf   :  { %5990 = vmatprep.subr.mxu1 %v6204_v0 }
0x2ed0   :  { %5991 = vmatpush3.msra.mxu1 %v6916_v59 }
0x2ed1   :  { %5992 = vmatprep.subr.mxu1 %v6204_v0 }
0x2ed2   :  { %5993 = vmatpush3.msra.mxu1 %v6921_v60 }
0x2ed3   :  { %5994 = vmatprep.subr.mxu1 %v6204_v0 }
0x2ed4   :  { %5995 = vmatpush3.msra.mxu1 %v6926_v61 }
0x2ed5   :  { %6004 = vmatprep.subr.mxu1 %v6204_v0 }
0x2f8d   :  { %v4608_v37 = vpop.f32.mrf.mxu1 }
0x2f8e   :  { %v4609_v54 = vadd.f32 %v6633_v6, %v4608_v37 }
0x2f8f   :  { %v5976_v25 = vpop.f32.mrf.mxu1 }
0x2f90   :  { %v4613_v1 = vmin.f32 %v4609_v54, 0.0  ;;  %vm4612_vm15 = vcmp.gt.f32.partialorder %v4609_v54, 0.0 }
0x2f92   :  { %v4614_v15 = vmul.f32 1.442695, %v4613_v1 }
0x2f94   :  { %6114 = vpow2.f32 %v4614_v15 }
0x2fa1   :  { %v6115_v16 = vpop.eup %6114 }
0x2fa2   :  { %v5195_v18 = vadd.f32 -1.0, %v6115_v16 }
0x2fa4   :  { %v4617_v26 = vsel %vm4612_vm15, %v4609_v54, %v5195_v18 }
0x2fa5   :  { %5986 = vmatmul.mubr.msk.f32.vlgmr.msra.gmra.mxu0 %vm190_vm2, %v4617_v26 }
0x2fa6   :  { %6000 = vmatpush3.msra.mxu0 %v6637_v39  ;;  %6001 = vmatprep.mubr.msk.f32.mxu0 %vm6205_vm0, %v6204_v0 }
0x2fa7   :  { %6015 = vmatprep.subr.mxu0 %v6204_v0 }
0x3065   :  { %v4687_v27 = vpop.f32.mrf.mxu0 }
0x3066   :  { %v4688_v20 = vadd.f32 %v6681_v63, %v4687_v27 }
0x3067   :  { %v5987_v28 = vpop.f32.mrf.mxu0 }
0x3068   :  { %v4692_v29 = vmin.f32 %v4688_v20, 0.0  ;;  %vm4691_vm3 = vcmp.gt.f32.partialorder %v4688_v20, 0.0 }
0x306a   :  { %v4693_v30 = vmul.f32 1.442695, %v4692_v29 }
0x306c   :  { %6116 = vpow2.f32 %v4693_v30 }
0x3079   :  { %v6117_v22 = vpop.eup %6116 }
0x307a   :  { %v5197_v17 = vadd.f32 -1.0, %v6117_v22 }
0x307c   :  { %v4696_v31 = vsel %vm4691_vm3, %v4688_v20, %v5197_v17 }
0x307d   :  { %5997 = vmatmul.mubr.msk.f32.vlgmr.msra.gmra.mxu1 %vm190_vm2, %v4696_v31 }
0x307e   :  { %6005 = vmatpush3.msra.mxu1 %v6645_v48  ;;  %6012 = vmatprep.mubr.msk.f32.mxu1 %vm6205_vm0, %v6204_v0 }
0x307f   :  { %6006 = vmatprep.subr.mxu1 %v6204_v0 }
0x3080   :  { %6007 = vmatpush3.msra.mxu1 %v6651_v24 }
0x3081   :  { %6008 = vmatprep.subr.mxu1 %v6204_v0 }
0x3082   :  { %6009 = vmatpush3.msra.mxu1 %v6655_v49 }
0x3083   :  { %6010 = vmatprep.subr.mxu1 %v6204_v0 }
0x3084   :  { %6011 = vmatpush3.msra.mxu1 %v6659_v50 }
0x3085   :  { %6026 = vmatprep.subr.mxu1 %v6204_v0 }
0x313d   :  { %v4766_v39 = vpop.f32.mrf.mxu1 }
0x313e   :  { %v4770_v32 = vadd.f32 %v4766_v39, %v4538_v7 }
0x313f   :  { %v5998_v48 = vpop.f32.mrf.mxu1 }
0x3140   :  { %v4771_v4 = vadd.f32 %v4770_v32, %v6945_v10 }
0x3142   :  { %6002 = vmatmul.mubr.msk.f32.vlgmr.msra.gmra.mxu0 %vm110_vm1, %v4771_v4 }
0x3143   :  { %6016 = vmatpush3.msra.mxu0 %v6912_v56  ;;  %6023 = vmatprep.mubr.msk.f32.mxu0 %vm6205_vm0, %v6204_v0 }
0x3144   :  { %6017 = vmatprep.subr.mxu0 %v6204_v0 }
0x3145   :  { %6018 = vmatpush3.msra.mxu0 %v6916_v59 }
0x3146   :  { %6019 = vmatprep.subr.mxu0 %v6204_v0 }
0x3147   :  { %6020 = vmatpush3.msra.mxu0 %v6921_v60 }
0x3148   :  { %6021 = vmatprep.subr.mxu0 %v6204_v0 }
0x3149   :  { %6022 = vmatpush3.msra.mxu0 %v6926_v61 }
0x3202   :  { %v4841_v24 = vpop.f32.mrf.mxu0 }
0x3203   :  { %v4842_v49 = vadd.f32 %v6633_v6, %v4841_v24 }
0x3204   :  { %v6003_v50 = vpop.f32.mrf.mxu0 }
0x3205   :  { %v4846_v5 = vmin.f32 %v4842_v49, 0.0  ;;  %vm4845_vm4 = vcmp.gt.f32.partialorder %v4842_v49, 0.0 }
0x3207   :  { %v4847_v35 = vmul.f32 1.442695, %v4846_v5 }
0x3209   :  { %6118 = vpow2.f32 %v4847_v35 }
0x3216   :  { %v6119_v33 = vpop.eup %6118 }
0x3217   :  { %v5200_v34 = vadd.f32 -1.0, %v6119_v33 }
0x3219   :  { %v4850_v36 = vsel %vm4845_vm4, %v4842_v49, %v5200_v34 }
0x321a   :  { %6013 = vmatmul.mubr.msk.f32.vlgmr.msra.gmra.mxu1 %vm190_vm2, %v4850_v36 }
0x321b   :  { %6028 = vmatprep.mubr.msk.f32.mxu1 %vm6205_vm0, %v6204_v0  ;;  %6027 = vmatpush3.msra.mxu1 %v47_v47  ;;  %vm5078_vm0 = vcmask 130048  }
0x32da   :  { %v4920_v21 = vpop.f32.mrf.mxu1 }
0x32db   :  { %v4921_v40 = vadd.f32 %v6681_v63, %v4920_v21  ;;  %v5098_v63 = vld [vmem:[#allocation5 + $0x68] ss:$0 sm:$0xff] }
0x32dc   :  { %v6014_v42 = vpop.f32.mrf.mxu1 }
0x32dd   :  { %v4925_v43 = vmin.f32 %v4921_v40, 0.0  ;;  %vm4924_vm5 = vcmp.gt.f32.partialorder %v4921_v40, 0.0 }
0x32df   :  { %v4926_v44 = vmul.f32 1.442695, %v4925_v43 }
0x32e1   :  { %6120 = vpow2.f32 %v4926_v44 }
0x32ee   :  { %v6121_v6 = vpop.eup %6120 }
0x32ef   :  { %v5202_v45 = vadd.f32 -1.0, %v6121_v6 }
0x32f1   :  { %v4929_v46 = vsel %vm4924_vm5, %v4921_v40, %v5202_v45 }
0x32f2   :  { %6024 = vmatmul.mubr.msk.f32.vlgmr.msra.gmra.mxu0 %vm190_vm2, %v4929_v46 }
0x33b2   :  { %v4999_v51 = vpop.f32.mrf.mxu0 }
0x33b3   :  { %v5003_v52 = vadd.f32 %v4999_v51, %v4771_v4 }
0x33b4   :  { %v6025_v53 = vpop.f32.mrf.mxu0 }
0x33b5   :  { %v5004_v0 = vadd.f32 %v5003_v52, %v6945_v10 }
0x33b7   :  { %6029 = vmatmul.mubr.msk.f32.vlgmr.msra.gmra.mxu1 %vm110_vm1, %v5004_v0 }
0x3477   :  { %v5074_v55 = vpop.f32.mrf.mxu1 }
0x3478   :  { %v5075_v38 = vadd.f32 %v5098_v63, %v5074_v55 }
0x3479   :  { %v6030_v57 = vpop.f32.mrf.mxu1 }
0x347a   :  { %5079 = vst.msk [vmem:[#allocation7] sm:$0xff] %vm5078_vm0, %v5075_v38 }
0x347b   :  { %6185 = shalt.err (!%p6182_p0)
}
0x347c   :  { %5089 = dma.vmem_to_hbm [thread:$0]  %s5087_s1, 128, %s7001_s2, [#allocation4]  }
0x347d   :  { %6198 = dma.done.wait [#allocation4], 128  }
0x347e   :  { %6199 = vsyncadd [#allocation4], 4294967168 }
0x347f   :  { %5093 = vsyncpa [#allocation3], 1 }
0x3480   :  { %5094 = vsyncpa [#allocation6], 1 }
0x3481   :  { %5095 = vsyncpa [#allocation4], 1 }

</bundles_post_ra>
